<compile_context>
chip_gen: v6e
topology: v6e:2x2x1
jax: 0.10.0
libtpu: 0.0.40
codegen_flags: <defaults>
</compile_context>

<pallas_src>
import functools

import jax
import jax.numpy as jnp
import numpy as np
from jax import lax
from jax.experimental import pallas as pl
from jax.experimental.pallas import tpu as pltpu


# ----------------------------- Pallas kernels -------------------------------

def _xconv_block_kernel(ploc_kd_ref, ploc_bk_ref, fts_bk_ref,
                        w1_ref, b1_ref, w2_ref, b2_ref,
                        wx_ref, bx_ref, wt1_ref, bt1_ref, wt2_ref, bt2_ref,
                        mf_ref, beff_ref,
                        y_ref, psum_ref, psq_ref,
                        *, K, B, NP, Cc):
    """XConv for a block of B representative points (K neighbors each)."""
    f32 = jnp.float32
    relu = lambda v: jnp.maximum(v, 0.0)

    # ---- lifted point features (XConv.dense1/dense2), B*K rows at once ----
    l1 = relu(jnp.dot(ploc_bk_ref[...], w1_ref[...],
                      preferred_element_type=f32) + b1_ref[...])
    l2 = relu(jnp.dot(l1, w2_ref[...],
                      preferred_element_type=f32) + b2_ref[...])
    fcat2 = jnp.concatenate([l2, fts_bk_ref[...]], axis=-1)        # [B*K, Cc]
    # leading-dim regroup only (K == 8 == sublane tile -> layout preserving)
    fcat3 = fcat2.reshape(B, K, Cc)                                # [B, K, Cc]

    # ---- X-transform: Conv2d(dims,K*K,(1,K)) + 2 Dense, as flat matmuls ----
    h = relu(jnp.dot(ploc_kd_ref[...], wx_ref[...],
                     preferred_element_type=f32) + bx_ref[...])    # [B, K*K]
    h = relu(jnp.dot(h, wt1_ref[...],
                     preferred_element_type=f32) + bt1_ref[...])
    xf = jnp.dot(h, wt2_ref[...],
                 preferred_element_type=f32) + bt2_ref[...]        # [B, K*K]

    # ---- fts_X = X @ fts_cat, built directly in flat [B, K*Cc] layout ------
    # fX[b, i*Cc + c] = sum_j xf[b, i*K + j] * fcat3[b, j, c]   (VPU MACs)
    fcat_j = [fcat3[:, j, :] for j in range(K)]                    # K x [B, Cc]
    cols = []
    for i in range(K):
        acc = xf[:, i * K:i * K + 1] * fcat_j[0]
        for j in range(1, K):
            acc = acc + xf[:, i * K + j:i * K + j + 1] * fcat_j[j]
        cols.append(acc)
    fX = jnp.concatenate(cols, axis=-1)                            # [B, K*Cc]

    # ---- end_conv: SepConv(Cc->C_out,(1,K)) fused into one matmul + ReLU ---
    y = relu(jnp.dot(fX, mf_ref[...],
                     preferred_element_type=f32) + beff_ref[...])  # [B, C_out]
    y_ref[...] = y

    # ---- fused partial BatchNorm statistics (pad rows masked out) ----------
    row0 = pl.program_id(0) * B
    rows = lax.broadcasted_iota(jnp.int32, (B, 1), 0) + row0
    valid = (rows < NP).astype(f32)
    ym = y * valid
    psum_ref[...] = jnp.sum(ym, axis=0, keepdims=True)
    psq_ref[...] = jnp.sum(ym * ym, axis=0, keepdims=True)


def _bn_apply_kernel(y_ref, scale_ref, shift_ref, o_ref):
    """Apply precomputed BatchNorm scale/shift to a (B, C_out) block."""
    o_ref[...] = y_ref[...] * scale_ref[...] + shift_ref[...]


# --------------------------------- wrapper -----------------------------------

def _round_up(x, m):
    return ((x + m - 1) // m) * m


def _dilated_knn_indices(rep_pts, pts, K, D):
    """r_indices_func: deterministic dilated KNN (plain JAX glue)."""
    d2 = jnp.sum((rep_pts[:, :, None, :] - pts[:, None, :, :]) ** 2, axis=-1)
    order = jnp.argsort(d2, axis=-1)
    return order[:, :, :K * D:D]                                   # [N, P, K]


def pointcnn_forward(rep_pts, pts, fts, params, *, K, D, block_points=None):
    N, P, dims = rep_pts.shape
    C1 = params["Wd"].shape[-1]
    C_mid = params["W1"].shape[-1]
    Cc = C_mid + C1
    C_out = params["Mf"].shape[-1]

    # PointCNN.dense hoisted before the gather (pointwise => identical math,
    # each source point processed once instead of up to K times).
    f_lift = jax.nn.relu(fts @ params["Wd"] + params["bd"])        # [N, np, C1]

    # region selection (data-dependent gather -> plain JAX glue)
    # TODO(synk): gather inside the kernel via PrefetchScalarGridSpec +
    # manual DMA to avoid materializing the K-duplicated regions in HBM.
    idx = _dilated_knn_indices(rep_pts, pts, K, D)                 # [N, P, K]
    gather = jax.vmap(lambda a, i: a[i])
    pts_reg = gather(pts, idx)                                     # [N, P, K, dims]
    fts_reg = gather(f_lift, idx)                                  # [N, P, K, C1]
    pts_local = pts_reg - rep_pts[:, :, None, :]                   # [N, P, K, dims]

    NP = N * P
    # Block of representative points per grid step.  >=256 rows feeds the
    # v6e/v7x 256x256 MXU; keep nblk >= 2 on v7x for both TensorCores.
    if block_points is None:
        B = 256 if NP >= 256 else _round_up(NP, 8)
    else:
        B = block_points
    NP_pad = _round_up(NP, B)
    nblk = NP_pad // B
    pad = NP_pad - NP

    ploc = pts_local.reshape(NP, K, dims)
    freg = fts_reg.reshape(NP, K, C1)
    if pad:
        ploc = jnp.pad(ploc, ((0, pad), (0, 0), (0, 0)))
        freg = jnp.pad(freg, ((0, pad), (0, 0), (0, 0)))
    ploc_bk = ploc.reshape(NP_pad * K, dims)        # rows for dense1/dense2
    fts_bk = freg.reshape(NP_pad * K, C1)           # lifted regional features
    ploc_kd = ploc.reshape(NP_pad, K * dims)        # rows for x_trans matmul

    w_names = ("W1", "b1", "W2", "b2", "Wxf", "bx",
               "Wt1", "bt1", "Wt2", "bt2", "Mf", "beff")
    w_list = [params[n] for n in w_names]

    def full2d(a):
        return pl.BlockSpec(a.shape, lambda i: (0, 0))

    in_specs = ([pl.BlockSpec((B, K * dims), lambda i: (i, 0)),
                 pl.BlockSpec((B * K, dims), lambda i: (i, 0)),
                 pl.BlockSpec((B * K, C1), lambda i: (i, 0))]
                + [full2d(w) for w in w_list])

    out_shapes = (jax.ShapeDtypeStruct((NP_pad, C_out), jnp.float32),
                  jax.ShapeDtypeStruct((nblk, 1, C_out), jnp.float32),
                  jax.ShapeDtypeStruct((nblk, 1, C_out), jnp.float32))
    out_specs = (pl.BlockSpec((B, C_out), lambda i: (i, 0)),
                 pl.BlockSpec((None, 1, C_out), lambda i: (i, 0, 0)),
                 pl.BlockSpec((None, 1, C_out), lambda i: (i, 0, 0)))

    y, psum, psq = pl.pallas_call(
        functools.partial(_xconv_block_kernel, K=K, B=B, NP=NP, Cc=Cc),
        grid=(nblk,),
        in_specs=in_specs,
        out_specs=out_specs,
        out_shape=out_shapes,
        compiler_params=pltpu.CompilerParams(
            dimension_semantics=("parallel",)),
    )(ploc_kd, ploc_bk, fts_bk, *w_list)

    # Tiny cross-block reduction for training-mode BatchNorm statistics.
    tot = jnp.sum(psum[:, 0, :], axis=0)
    tot2 = jnp.sum(psq[:, 0, :], axis=0)
    mean = tot / NP
    var = jnp.maximum(tot2 / NP - mean * mean, 0.0)
    scale = params["gamma"][0] * lax.rsqrt(var + 1e-5)
    shift = params["beta"][0] - mean * scale

    out = pl.pallas_call(
        _bn_apply_kernel,
        grid=(nblk,),
        in_specs=[pl.BlockSpec((B, C_out), lambda i: (i, 0)),
                  pl.BlockSpec((1, C_out), lambda i: (0, 0)),
                  pl.BlockSpec((1, C_out), lambda i: (0, 0))],
        out_specs=pl.BlockSpec((B, C_out), lambda i: (i, 0)),
        out_shape=jax.ShapeDtypeStruct((NP_pad, C_out), jnp.float32),
        compiler_params=pltpu.CompilerParams(
            dimension_semantics=("parallel",)),
    )(y, scale[None, :], shift[None, :])

    return out[:NP].reshape(N, P, C_out)


# ------------------------------ parameters -----------------------------------

def init_params(key, *, C_in, C_out, dims, K):
    C1 = C_out // 2
    C_mid = C_out // 2 if C_in == 0 else C_out // 4
    dm = 1 if C_in == 0 else min(int(np.ceil(C_out / C_in)), 4)
    Cc = C_mid + C1
    KK = K * K
    keys = jax.random.split(key, 16)

    def lin(k, fi, fo):
        return (jax.random.normal(k, (fi, fo), jnp.float32) / np.sqrt(fi)).astype(jnp.float32)

    def bias(k, n):
        return 0.1 * jax.random.normal(k, (1, n), jnp.float32)

    p = {}
    p["Wd"], p["bd"] = lin(keys[0], C_in, C1), bias(keys[1], C1)          # PointCNN.dense
    p["W1"], p["b1"] = lin(keys[2], dims, C_mid), bias(keys[3], C_mid)     # XConv.dense1
    p["W2"], p["b2"] = lin(keys[4], C_mid, C_mid), bias(keys[5], C_mid)    # XConv.dense2

    # x_trans Conv2d(dims, K*K, (1, K)) -- torch weight [K*K, dims, 1, K],
    # flattened channels-last to one matmul operand [K*dims, K*K].
    conv_w = jax.random.normal(keys[6], (KK, dims, 1, K), jnp.float32) / np.sqrt(dims * K)
    wx3 = jnp.transpose(conv_w[:, :, 0, :], (2, 1, 0))                     # [K, dims, K*K]
    p["Wxf"] = wx3.reshape(K * dims, KK)
    p["bx"] = bias(keys[7], KK)
    p["Wt1"], p["bt1"] = lin(keys[8], KK, KK), bias(keys[9], KK)
    p["Wt2"], p["bt2"] = lin(keys[10], KK, KK), bias(keys[11], KK)

    # end_conv SepConv: depthwise [Cc*dm,1,1,K] (+bias), pointwise [C_out,Cc*dm,1,1]
    # (no bias); fused into one contraction matrix Mf [K*Cc, C_out] + beff.
    dw_w = jax.random.normal(keys[12], (Cc * dm, 1, 1, K), jnp.float32) / np.sqrt(K)
    dw_b = 0.1 * jax.random.normal(keys[13], (Cc * dm,), jnp.float32)
    pw_w = jax.random.normal(keys[14], (C_out, Cc * dm, 1, 1), jnp.float32) / np.sqrt(Cc * dm)
    dw = dw_w[:, 0, 0, :].reshape(Cc, dm, K)                               # [c, m, k]
    pw = pw_w[:, :, 0, 0].reshape(C_out, Cc, dm)                           # [o, c, m]
    M = jnp.einsum("cmk,ocm->kco", dw, pw)                                 # [K, Cc, C_out]
    p["Mf"] = M.reshape(K * Cc, C_out)
    p["beff"] = jnp.einsum("j,oj->o", dw_b, pw_w[:, :, 0, 0])[None, :]     # [1, C_out]

    p["gamma"] = jnp.ones((1, C_out), jnp.float32)                         # BN weight
    p["beta"] = jnp.zeros((1, C_out), jnp.float32)                         # BN bias
    return p


# ------------------------------ pure-JAX reference ---------------------------

def pointcnn_reference(rep_pts, pts, fts, params, *, K, D):
    relu = jax.nn.relu
    N, P, dims = rep_pts.shape
    f = relu(fts @ params["Wd"] + params["bd"][0])
    idx = _dilated_knn_indices(rep_pts, pts, K, D)
    gather = jax.vmap(lambda a, i: a[i])
    pts_reg, fts_reg = gather(pts, idx), gather(f, idx)
    pts_local = pts_reg - rep_pts[:, :, None, :]
    l2 = relu(relu(pts_local @ params["W1"] + params["b1"][0]) @ params["W2"] + params["b2"][0])
    fcat = jnp.concatenate([l2, fts_reg], axis=-1)
    KK = K * K
    Wx3 = params["Wxf"].reshape(K, dims, KK)
    h = relu(jnp.einsum("npkd,kdo->npo", pts_local, Wx3) + params["bx"][0])
    h = relu(h @ params["Wt1"] + params["bt1"][0])
    xf = h @ params["Wt2"] + params["bt2"][0]
    X = xf.reshape(N, P, K, K)
    fX = jnp.einsum("npij,npjc->npic", X, fcat)
    Cc = fcat.shape[-1]
    M3 = params["Mf"].reshape(K, Cc, -1)
    y = relu(jnp.einsum("npkc,kco->npo", fX, M3) + params["beff"][0])
    mean = y.mean(axis=(0, 1), keepdims=True)
    var = jnp.square(y - mean).mean(axis=(0, 1), keepdims=True)
    return (y - mean) * lax.rsqrt(var + 1e-5) * params["gamma"][0] + params["beta"][0]


# ----------------------------------- main -------------------------------------

if __name__ == "__main__":
    N, num_pts, P = 2, 32, 8
    dims, C_in, C_out, K, D = 3, 4, 16, 8, 1

    key = jax.random.PRNGKey(0)
    k_pts, k_fts, k_par = jax.random.split(key, 3)
    pts = jax.random.normal(k_pts, (N, num_pts, dims), jnp.float32)
    fts = jax.random.normal(k_fts, (N, num_pts, C_in), jnp.float32)
    rep_pts = pts[:, :P, :]                      # deterministic representative points

    params = init_params(k_par, C_in=C_in, C_out=C_out, dims=dims, K=K)

    out = pointcnn_forward(rep_pts, pts, fts, params, K=K, D=D)
    out = jax.block_until_ready(out)

    assert out.shape == (N, P, C_out)
    ref = pointcnn_reference(rep_pts, pts, fts, params, K=K, D=D)
    np.testing.assert_allclose(np.asarray(out), np.asarray(ref), rtol=5e-2, atol=5e-2)

    print("KERNEL_OK")
</pallas_src>

<mosaic_0001>
module attributes {stable_mosaic.version = 11 : i64} {
  func.func @_xconv_block_kernel(%arg0: i32, %arg1: memref<16x24xf32, #tpu.memory_space<vmem>>, %arg2: memref<128x3xf32, #tpu.memory_space<vmem>>, %arg3: memref<128x8xf32, #tpu.memory_space<vmem>>, %arg4: memref<3x4xf32, #tpu.memory_space<vmem>>, %arg5: memref<1x4xf32, #tpu.memory_space<vmem>>, %arg6: memref<4x4xf32, #tpu.memory_space<vmem>>, %arg7: memref<1x4xf32, #tpu.memory_space<vmem>>, %arg8: memref<24x64xf32, #tpu.memory_space<vmem>>, %arg9: memref<1x64xf32, #tpu.memory_space<vmem>>, %arg10: memref<64x64xf32, #tpu.memory_space<vmem>>, %arg11: memref<1x64xf32, #tpu.memory_space<vmem>>, %arg12: memref<64x64xf32, #tpu.memory_space<vmem>>, %arg13: memref<1x64xf32, #tpu.memory_space<vmem>>, %arg14: memref<96x16xf32, #tpu.memory_space<vmem>>, %arg15: memref<1x16xf32, #tpu.memory_space<vmem>>, %arg16: memref<16x16xf32, #tpu.memory_space<vmem>>, %arg17: memref<1x1x16xf32, #tpu.memory_space<vmem>>, %arg18: memref<1x1x16xf32, #tpu.memory_space<vmem>>) attributes {dimension_semantics = [#tpu.dimension_semantics<parallel>], iteration_bounds = array<i64: 1>, scalar_prefetch = 0 : i64, scratch_operands = 0 : i64, tpu.core_type = #tpu.core_type<tc>, window_params = [{transform_indices = @transform_0, window_bounds = array<i64: 16, 24>}, {transform_indices = @transform_1, window_bounds = array<i64: 128, 3>}, {transform_indices = @transform_2, window_bounds = array<i64: 128, 8>}, {pipeline_mode = #tpu.pipeline_mode<synchronous>, transform_indices = @transform_3, window_bounds = array<i64: 3, 4>}, {pipeline_mode = #tpu.pipeline_mode<synchronous>, transform_indices = @transform_4, window_bounds = array<i64: 1, 4>}, {pipeline_mode = #tpu.pipeline_mode<synchronous>, transform_indices = @transform_5, window_bounds = array<i64: 4, 4>}, {pipeline_mode = #tpu.pipeline_mode<synchronous>, transform_indices = @transform_6, window_bounds = array<i64: 1, 4>}, {pipeline_mode = #tpu.pipeline_mode<synchronous>, transform_indices = @transform_7, window_bounds = array<i64: 24, 64>}, {pipeline_mode = #tpu.pipeline_mode<synchronous>, transform_indices = @transform_8, window_bounds = array<i64: 1, 64>}, {pipeline_mode = #tpu.pipeline_mode<synchronous>, transform_indices = @transform_9, window_bounds = array<i64: 64, 64>}, {pipeline_mode = #tpu.pipeline_mode<synchronous>, transform_indices = @transform_10, window_bounds = array<i64: 1, 64>}, {pipeline_mode = #tpu.pipeline_mode<synchronous>, transform_indices = @transform_11, window_bounds = array<i64: 64, 64>}, {pipeline_mode = #tpu.pipeline_mode<synchronous>, transform_indices = @transform_12, window_bounds = array<i64: 1, 64>}, {pipeline_mode = #tpu.pipeline_mode<synchronous>, transform_indices = @transform_13, window_bounds = array<i64: 96, 16>}, {pipeline_mode = #tpu.pipeline_mode<synchronous>, transform_indices = @transform_14, window_bounds = array<i64: 1, 16>}, {transform_indices = @transform_15, window_bounds = array<i64: 16, 16>}, {transform_indices = @transform_16, window_bounds = array<i64: 1, 1, 16>}, {transform_indices = @transform_17, window_bounds = array<i64: 1, 1, 16>}]} {
    %c0 = arith.constant 0 : index
    %c0_0 = arith.constant 0 : index
    %0 = vector.load %arg2[%c0, %c0_0] : memref<128x3xf32, #tpu.memory_space<vmem>>, vector<128x3xf32>
    %c0_1 = arith.constant 0 : index
    %c0_2 = arith.constant 0 : index
    %1 = vector.load %arg4[%c0_1, %c0_2] : memref<3x4xf32, #tpu.memory_space<vmem>>, vector<3x4xf32>
    %cst = arith.constant dense<0.000000e+00> : vector<128x4xf32>
    %2 = tpu.matmul %0, %1, %cst {dimension_numbers = #tpu.dot_dimension_numbers<[1], [0], [0], [1], [0, 0, 1, 1], [], []>} : vector<128x3xf32>, vector<3x4xf32>, vector<128x4xf32> -> vector<128x4xf32>
    %c0_3 = arith.constant 0 : index
    %c0_4 = arith.constant 0 : index
    %3 = vector.load %arg5[%c0_3, %c0_4] : memref<1x4xf32, #tpu.memory_space<vmem>>, vector<1x4xf32>
    %4 = vector.broadcast %3 : vector<1x4xf32> to vector<128x4xf32>
    %5 = arith.addf %2, %4 : vector<128x4xf32>
    %cst_5 = arith.constant 0.000000e+00 : f32
    %6 = vector.broadcast %cst_5 : f32 to vector<128x4xf32>
    %7 = arith.maximumf %5, %6 : vector<128x4xf32>
    %c0_6 = arith.constant 0 : index
    %c0_7 = arith.constant 0 : index
    %8 = vector.load %arg6[%c0_6, %c0_7] : memref<4x4xf32, #tpu.memory_space<vmem>>, vector<4x4xf32>
    %cst_8 = arith.constant dense<0.000000e+00> : vector<128x4xf32>
    %9 = tpu.matmul %7, %8, %cst_8 {dimension_numbers = #tpu.dot_dimension_numbers<[1], [0], [0], [1], [0, 0, 1, 1], [], []>} : vector<128x4xf32>, vector<4x4xf32>, vector<128x4xf32> -> vector<128x4xf32>
    %c0_9 = arith.constant 0 : index
    %c0_10 = arith.constant 0 : index
    %10 = vector.load %arg7[%c0_9, %c0_10] : memref<1x4xf32, #tpu.memory_space<vmem>>, vector<1x4xf32>
    %11 = vector.broadcast %10 : vector<1x4xf32> to vector<128x4xf32>
    %12 = arith.addf %9, %11 : vector<128x4xf32>
    %cst_11 = arith.constant 0.000000e+00 : f32
    %13 = vector.broadcast %cst_11 : f32 to vector<128x4xf32>
    %14 = arith.maximumf %12, %13 : vector<128x4xf32>
    %c0_12 = arith.constant 0 : index
    %c0_13 = arith.constant 0 : index
    %15 = vector.load %arg3[%c0_12, %c0_13] : memref<128x8xf32, #tpu.memory_space<vmem>>, vector<128x8xf32>
    %16 = tpu.concatenate %14, %15 in 1 : vector<128x4xf32>, vector<128x8xf32> -> vector<128x12xf32>
    %17 = vector.shape_cast %16 : vector<128x12xf32> to vector<16x8x12xf32>
    %c0_14 = arith.constant 0 : index
    %c0_15 = arith.constant 0 : index
    %18 = vector.load %arg1[%c0_14, %c0_15] : memref<16x24xf32, #tpu.memory_space<vmem>>, vector<16x24xf32>
    %c0_16 = arith.constant 0 : index
    %c0_17 = arith.constant 0 : index
    %19 = vector.load %arg8[%c0_16, %c0_17] : memref<24x64xf32, #tpu.memory_space<vmem>>, vector<24x64xf32>
    %cst_18 = arith.constant dense<0.000000e+00> : vector<16x64xf32>
    %20 = tpu.matmul %18, %19, %cst_18 {dimension_numbers = #tpu.dot_dimension_numbers<[1], [0], [0], [1], [0, 0, 1, 1], [], []>} : vector<16x24xf32>, vector<24x64xf32>, vector<16x64xf32> -> vector<16x64xf32>
    %c0_19 = arith.constant 0 : index
    %c0_20 = arith.constant 0 : index
    %21 = vector.load %arg9[%c0_19, %c0_20] : memref<1x64xf32, #tpu.memory_space<vmem>>, vector<1x64xf32>
    %22 = vector.broadcast %21 : vector<1x64xf32> to vector<16x64xf32>
    %23 = arith.addf %20, %22 : vector<16x64xf32>
    %cst_21 = arith.constant 0.000000e+00 : f32
    %24 = vector.broadcast %cst_21 : f32 to vector<16x64xf32>
    %25 = arith.maximumf %23, %24 : vector<16x64xf32>
    %c0_22 = arith.constant 0 : index
    %c0_23 = arith.constant 0 : index
    %26 = vector.load %arg10[%c0_22, %c0_23] : memref<64x64xf32, #tpu.memory_space<vmem>>, vector<64x64xf32>
    %cst_24 = arith.constant dense<0.000000e+00> : vector<16x64xf32>
    %27 = tpu.matmul %25, %26, %cst_24 {dimension_numbers = #tpu.dot_dimension_numbers<[1], [0], [0], [1], [0, 0, 1, 1], [], []>} : vector<16x64xf32>, vector<64x64xf32>, vector<16x64xf32> -> vector<16x64xf32>
    %c0_25 = arith.constant 0 : index
    %c0_26 = arith.constant 0 : index
    %28 = vector.load %arg11[%c0_25, %c0_26] : memref<1x64xf32, #tpu.memory_space<vmem>>, vector<1x64xf32>
    %29 = vector.broadcast %28 : vector<1x64xf32> to vector<16x64xf32>
    %30 = arith.addf %27, %29 : vector<16x64xf32>
    %cst_27 = arith.constant 0.000000e+00 : f32
    %31 = vector.broadcast %cst_27 : f32 to vector<16x64xf32>
    %32 = arith.maximumf %30, %31 : vector<16x64xf32>
    %c0_28 = arith.constant 0 : index
    %c0_29 = arith.constant 0 : index
    %33 = vector.load %arg12[%c0_28, %c0_29] : memref<64x64xf32, #tpu.memory_space<vmem>>, vector<64x64xf32>
    %cst_30 = arith.constant dense<0.000000e+00> : vector<16x64xf32>
    %34 = tpu.matmul %32, %33, %cst_30 {dimension_numbers = #tpu.dot_dimension_numbers<[1], [0], [0], [1], [0, 0, 1, 1], [], []>} : vector<16x64xf32>, vector<64x64xf32>, vector<16x64xf32> -> vector<16x64xf32>
    %c0_31 = arith.constant 0 : index
    %c0_32 = arith.constant 0 : index
    %35 = vector.load %arg13[%c0_31, %c0_32] : memref<1x64xf32, #tpu.memory_space<vmem>>, vector<1x64xf32>
    %36 = vector.broadcast %35 : vector<1x64xf32> to vector<16x64xf32>
    %37 = arith.addf %34, %36 : vector<16x64xf32>
    %38 = vector.extract_strided_slice %17 {offsets = [0, 0, 0], sizes = [16, 1, 12], strides = [1, 1, 1]} : vector<16x8x12xf32> to vector<16x1x12xf32>
    %39 = vector.shape_cast %38 : vector<16x1x12xf32> to vector<16x12xf32>
    %40 = vector.extract_strided_slice %17 {offsets = [0, 1, 0], sizes = [16, 1, 12], strides = [1, 1, 1]} : vector<16x8x12xf32> to vector<16x1x12xf32>
    %41 = vector.shape_cast %40 : vector<16x1x12xf32> to vector<16x12xf32>
    %42 = vector.extract_strided_slice %17 {offsets = [0, 2, 0], sizes = [16, 1, 12], strides = [1, 1, 1]} : vector<16x8x12xf32> to vector<16x1x12xf32>
    %43 = vector.shape_cast %42 : vector<16x1x12xf32> to vector<16x12xf32>
    %44 = vector.extract_strided_slice %17 {offsets = [0, 3, 0], sizes = [16, 1, 12], strides = [1, 1, 1]} : vector<16x8x12xf32> to vector<16x1x12xf32>
    %45 = vector.shape_cast %44 : vector<16x1x12xf32> to vector<16x12xf32>
    %46 = vector.extract_strided_slice %17 {offsets = [0, 4, 0], sizes = [16, 1, 12], strides = [1, 1, 1]} : vector<16x8x12xf32> to vector<16x1x12xf32>
    %47 = vector.shape_cast %46 : vector<16x1x12xf32> to vector<16x12xf32>
    %48 = vector.extract_strided_slice %17 {offsets = [0, 5, 0], sizes = [16, 1, 12], strides = [1, 1, 1]} : vector<16x8x12xf32> to vector<16x1x12xf32>
    %49 = vector.shape_cast %48 : vector<16x1x12xf32> to vector<16x12xf32>
    %50 = vector.extract_strided_slice %17 {offsets = [0, 6, 0], sizes = [16, 1, 12], strides = [1, 1, 1]} : vector<16x8x12xf32> to vector<16x1x12xf32>
    %51 = vector.shape_cast %50 : vector<16x1x12xf32> to vector<16x12xf32>
    %52 = vector.extract_strided_slice %17 {offsets = [0, 7, 0], sizes = [16, 1, 12], strides = [1, 1, 1]} : vector<16x8x12xf32> to vector<16x1x12xf32>
    %53 = vector.shape_cast %52 : vector<16x1x12xf32> to vector<16x12xf32>
    %54 = vector.extract_strided_slice %37 {offsets = [0, 0], sizes = [16, 1], strides = [1, 1]} : vector<16x64xf32> to vector<16x1xf32>
    %55 = vector.broadcast %54 : vector<16x1xf32> to vector<16x12xf32>
    %56 = arith.mulf %55, %39 : vector<16x12xf32>
    %57 = vector.extract_strided_slice %37 {offsets = [0, 1], sizes = [16, 1], strides = [1, 1]} : vector<16x64xf32> to vector<16x1xf32>
    %58 = vector.broadcast %57 : vector<16x1xf32> to vector<16x12xf32>
    %59 = arith.mulf %58, %41 : vector<16x12xf32>
    %60 = arith.addf %56, %59 : vector<16x12xf32>
    %61 = vector.extract_strided_slice %37 {offsets = [0, 2], sizes = [16, 1], strides = [1, 1]} : vector<16x64xf32> to vector<16x1xf32>
    %62 = vector.broadcast %61 : vector<16x1xf32> to vector<16x12xf32>
    %63 = arith.mulf %62, %43 : vector<16x12xf32>
    %64 = arith.addf %60, %63 : vector<16x12xf32>
    %65 = vector.extract_strided_slice %37 {offsets = [0, 3], sizes = [16, 1], strides = [1, 1]} : vector<16x64xf32> to vector<16x1xf32>
    %66 = vector.broadcast %65 : vector<16x1xf32> to vector<16x12xf32>
    %67 = arith.mulf %66, %45 : vector<16x12xf32>
    %68 = arith.addf %64, %67 : vector<16x12xf32>
    %69 = vector.extract_strided_slice %37 {offsets = [0, 4], sizes = [16, 1], strides = [1, 1]} : vector<16x64xf32> to vector<16x1xf32>
    %70 = vector.broadcast %69 : vector<16x1xf32> to vector<16x12xf32>
    %71 = arith.mulf %70, %47 : vector<16x12xf32>
    %72 = arith.addf %68, %71 : vector<16x12xf32>
    %73 = vector.extract_strided_slice %37 {offsets = [0, 5], sizes = [16, 1], strides = [1, 1]} : vector<16x64xf32> to vector<16x1xf32>
    %74 = vector.broadcast %73 : vector<16x1xf32> to vector<16x12xf32>
    %75 = arith.mulf %74, %49 : vector<16x12xf32>
    %76 = arith.addf %72, %75 : vector<16x12xf32>
    %77 = vector.extract_strided_slice %37 {offsets = [0, 6], sizes = [16, 1], strides = [1, 1]} : vector<16x64xf32> to vector<16x1xf32>
    %78 = vector.broadcast %77 : vector<16x1xf32> to vector<16x12xf32>
    %79 = arith.mulf %78, %51 : vector<16x12xf32>
    %80 = arith.addf %76, %79 : vector<16x12xf32>
    %81 = vector.extract_strided_slice %37 {offsets = [0, 7], sizes = [16, 1], strides = [1, 1]} : vector<16x64xf32> to vector<16x1xf32>
    %82 = vector.broadcast %81 : vector<16x1xf32> to vector<16x12xf32>
    %83 = arith.mulf %82, %53 : vector<16x12xf32>
    %84 = arith.addf %80, %83 : vector<16x12xf32>
    %85 = vector.extract_strided_slice %37 {offsets = [0, 8], sizes = [16, 1], strides = [1, 1]} : vector<16x64xf32> to vector<16x1xf32>
    %86 = vector.broadcast %85 : vector<16x1xf32> to vector<16x12xf32>
    %87 = arith.mulf %86, %39 : vector<16x12xf32>
    %88 = vector.extract_strided_slice %37 {offsets = [0, 9], sizes = [16, 1], strides = [1, 1]} : vector<16x64xf32> to vector<16x1xf32>
    %89 = vector.broadcast %88 : vector<16x1xf32> to vector<16x12xf32>
    %90 = arith.mulf %89, %41 : vector<16x12xf32>
    %91 = arith.addf %87, %90 : vector<16x12xf32>
    %92 = vector.extract_strided_slice %37 {offsets = [0, 10], sizes = [16, 1], strides = [1, 1]} : vector<16x64xf32> to vector<16x1xf32>
    %93 = vector.broadcast %92 : vector<16x1xf32> to vector<16x12xf32>
    %94 = arith.mulf %93, %43 : vector<16x12xf32>
    %95 = arith.addf %91, %94 : vector<16x12xf32>
    %96 = vector.extract_strided_slice %37 {offsets = [0, 11], sizes = [16, 1], strides = [1, 1]} : vector<16x64xf32> to vector<16x1xf32>
    %97 = vector.broadcast %96 : vector<16x1xf32> to vector<16x12xf32>
    %98 = arith.mulf %97, %45 : vector<16x12xf32>
    %99 = arith.addf %95, %98 : vector<16x12xf32>
    %100 = vector.extract_strided_slice %37 {offsets = [0, 12], sizes = [16, 1], strides = [1, 1]} : vector<16x64xf32> to vector<16x1xf32>
    %101 = vector.broadcast %100 : vector<16x1xf32> to vector<16x12xf32>
    %102 = arith.mulf %101, %47 : vector<16x12xf32>
    %103 = arith.addf %99, %102 : vector<16x12xf32>
    %104 = vector.extract_strided_slice %37 {offsets = [0, 13], sizes = [16, 1], strides = [1, 1]} : vector<16x64xf32> to vector<16x1xf32>
    %105 = vector.broadcast %104 : vector<16x1xf32> to vector<16x12xf32>
    %106 = arith.mulf %105, %49 : vector<16x12xf32>
    %107 = arith.addf %103, %106 : vector<16x12xf32>
    %108 = vector.extract_strided_slice %37 {offsets = [0, 14], sizes = [16, 1], strides = [1, 1]} : vector<16x64xf32> to vector<16x1xf32>
    %109 = vector.broadcast %108 : vector<16x1xf32> to vector<16x12xf32>
    %110 = arith.mulf %109, %51 : vector<16x12xf32>
    %111 = arith.addf %107, %110 : vector<16x12xf32>
    %112 = vector.extract_strided_slice %37 {offsets = [0, 15], sizes = [16, 1], strides = [1, 1]} : vector<16x64xf32> to vector<16x1xf32>
    %113 = vector.broadcast %112 : vector<16x1xf32> to vector<16x12xf32>
    %114 = arith.mulf %113, %53 : vector<16x12xf32>
    %115 = arith.addf %111, %114 : vector<16x12xf32>
    %116 = vector.extract_strided_slice %37 {offsets = [0, 16], sizes = [16, 1], strides = [1, 1]} : vector<16x64xf32> to vector<16x1xf32>
    %117 = vector.broadcast %116 : vector<16x1xf32> to vector<16x12xf32>
    %118 = arith.mulf %117, %39 : vector<16x12xf32>
    %119 = vector.extract_strided_slice %37 {offsets = [0, 17], sizes = [16, 1], strides = [1, 1]} : vector<16x64xf32> to vector<16x1xf32>
    %120 = vector.broadcast %119 : vector<16x1xf32> to vector<16x12xf32>
    %121 = arith.mulf %120, %41 : vector<16x12xf32>
    %122 = arith.addf %118, %121 : vector<16x12xf32>
    %123 = vector.extract_strided_slice %37 {offsets = [0, 18], sizes = [16, 1], strides = [1, 1]} : vector<16x64xf32> to vector<16x1xf32>
    %124 = vector.broadcast %123 : vector<16x1xf32> to vector<16x12xf32>
    %125 = arith.mulf %124, %43 : vector<16x12xf32>
    %126 = arith.addf %122, %125 : vector<16x12xf32>
    %127 = vector.extract_strided_slice %37 {offsets = [0, 19], sizes = [16, 1], strides = [1, 1]} : vector<16x64xf32> to vector<16x1xf32>
    %128 = vector.broadcast %127 : vector<16x1xf32> to vector<16x12xf32>
    %129 = arith.mulf %128, %45 : vector<16x12xf32>
    %130 = arith.addf %126, %129 : vector<16x12xf32>
    %131 = vector.extract_strided_slice %37 {offsets = [0, 20], sizes = [16, 1], strides = [1, 1]} : vector<16x64xf32> to vector<16x1xf32>
    %132 = vector.broadcast %131 : vector<16x1xf32> to vector<16x12xf32>
    %133 = arith.mulf %132, %47 : vector<16x12xf32>
    %134 = arith.addf %130, %133 : vector<16x12xf32>
    %135 = vector.extract_strided_slice %37 {offsets = [0, 21], sizes = [16, 1], strides = [1, 1]} : vector<16x64xf32> to vector<16x1xf32>
    %136 = vector.broadcast %135 : vector<16x1xf32> to vector<16x12xf32>
    %137 = arith.mulf %136, %49 : vector<16x12xf32>
    %138 = arith.addf %134, %137 : vector<16x12xf32>
    %139 = vector.extract_strided_slice %37 {offsets = [0, 22], sizes = [16, 1], strides = [1, 1]} : vector<16x64xf32> to vector<16x1xf32>
    %140 = vector.broadcast %139 : vector<16x1xf32> to vector<16x12xf32>
    %141 = arith.mulf %140, %51 : vector<16x12xf32>
    %142 = arith.addf %138, %141 : vector<16x12xf32>
    %143 = vector.extract_strided_slice %37 {offsets = [0, 23], sizes = [16, 1], strides = [1, 1]} : vector<16x64xf32> to vector<16x1xf32>
    %144 = vector.broadcast %143 : vector<16x1xf32> to vector<16x12xf32>
    %145 = arith.mulf %144, %53 : vector<16x12xf32>
    %146 = arith.addf %142, %145 : vector<16x12xf32>
    %147 = vector.extract_strided_slice %37 {offsets = [0, 24], sizes = [16, 1], strides = [1, 1]} : vector<16x64xf32> to vector<16x1xf32>
    %148 = vector.broadcast %147 : vector<16x1xf32> to vector<16x12xf32>
    %149 = arith.mulf %148, %39 : vector<16x12xf32>
    %150 = vector.extract_strided_slice %37 {offsets = [0, 25], sizes = [16, 1], strides = [1, 1]} : vector<16x64xf32> to vector<16x1xf32>
    %151 = vector.broadcast %150 : vector<16x1xf32> to vector<16x12xf32>
    %152 = arith.mulf %151, %41 : vector<16x12xf32>
    %153 = arith.addf %149, %152 : vector<16x12xf32>
    %154 = vector.extract_strided_slice %37 {offsets = [0, 26], sizes = [16, 1], strides = [1, 1]} : vector<16x64xf32> to vector<16x1xf32>
    %155 = vector.broadcast %154 : vector<16x1xf32> to vector<16x12xf32>
    %156 = arith.mulf %155, %43 : vector<16x12xf32>
    %157 = arith.addf %153, %156 : vector<16x12xf32>
    %158 = vector.extract_strided_slice %37 {offsets = [0, 27], sizes = [16, 1], strides = [1, 1]} : vector<16x64xf32> to vector<16x1xf32>
    %159 = vector.broadcast %158 : vector<16x1xf32> to vector<16x12xf32>
    %160 = arith.mulf %159, %45 : vector<16x12xf32>
    %161 = arith.addf %157, %160 : vector<16x12xf32>
    %162 = vector.extract_strided_slice %37 {offsets = [0, 28], sizes = [16, 1], strides = [1, 1]} : vector<16x64xf32> to vector<16x1xf32>
    %163 = vector.broadcast %162 : vector<16x1xf32> to vector<16x12xf32>
    %164 = arith.mulf %163, %47 : vector<16x12xf32>
    %165 = arith.addf %161, %164 : vector<16x12xf32>
    %166 = vector.extract_strided_slice %37 {offsets = [0, 29], sizes = [16, 1], strides = [1, 1]} : vector<16x64xf32> to vector<16x1xf32>
    %167 = vector.broadcast %166 : vector<16x1xf32> to vector<16x12xf32>
    %168 = arith.mulf %167, %49 : vector<16x12xf32>
    %169 = arith.addf %165, %168 : vector<16x12xf32>
    %170 = vector.extract_strided_slice %37 {offsets = [0, 30], sizes = [16, 1], strides = [1, 1]} : vector<16x64xf32> to vector<16x1xf32>
    %171 = vector.broadcast %170 : vector<16x1xf32> to vector<16x12xf32>
    %172 = arith.mulf %171, %51 : vector<16x12xf32>
    %173 = arith.addf %169, %172 : vector<16x12xf32>
    %174 = vector.extract_strided_slice %37 {offsets = [0, 31], sizes = [16, 1], strides = [1, 1]} : vector<16x64xf32> to vector<16x1xf32>
    %175 = vector.broadcast %174 : vector<16x1xf32> to vector<16x12xf32>
    %176 = arith.mulf %175, %53 : vector<16x12xf32>
    %177 = arith.addf %173, %176 : vector<16x12xf32>
    %178 = vector.extract_strided_slice %37 {offsets = [0, 32], sizes = [16, 1], strides = [1, 1]} : vector<16x64xf32> to vector<16x1xf32>
    %179 = vector.broadcast %178 : vector<16x1xf32> to vector<16x12xf32>
    %180 = arith.mulf %179, %39 : vector<16x12xf32>
    %181 = vector.extract_strided_slice %37 {offsets = [0, 33], sizes = [16, 1], strides = [1, 1]} : vector<16x64xf32> to vector<16x1xf32>
    %182 = vector.broadcast %181 : vector<16x1xf32> to vector<16x12xf32>
    %183 = arith.mulf %182, %41 : vector<16x12xf32>
    %184 = arith.addf %180, %183 : vector<16x12xf32>
    %185 = vector.extract_strided_slice %37 {offsets = [0, 34], sizes = [16, 1], strides = [1, 1]} : vector<16x64xf32> to vector<16x1xf32>
    %186 = vector.broadcast %185 : vector<16x1xf32> to vector<16x12xf32>
    %187 = arith.mulf %186, %43 : vector<16x12xf32>
    %188 = arith.addf %184, %187 : vector<16x12xf32>
    %189 = vector.extract_strided_slice %37 {offsets = [0, 35], sizes = [16, 1], strides = [1, 1]} : vector<16x64xf32> to vector<16x1xf32>
    %190 = vector.broadcast %189 : vector<16x1xf32> to vector<16x12xf32>
    %191 = arith.mulf %190, %45 : vector<16x12xf32>
    %192 = arith.addf %188, %191 : vector<16x12xf32>
    %193 = vector.extract_strided_slice %37 {offsets = [0, 36], sizes = [16, 1], strides = [1, 1]} : vector<16x64xf32> to vector<16x1xf32>
    %194 = vector.broadcast %193 : vector<16x1xf32> to vector<16x12xf32>
    %195 = arith.mulf %194, %47 : vector<16x12xf32>
    %196 = arith.addf %192, %195 : vector<16x12xf32>
    %197 = vector.extract_strided_slice %37 {offsets = [0, 37], sizes = [16, 1], strides = [1, 1]} : vector<16x64xf32> to vector<16x1xf32>
    %198 = vector.broadcast %197 : vector<16x1xf32> to vector<16x12xf32>
    %199 = arith.mulf %198, %49 : vector<16x12xf32>
    %200 = arith.addf %196, %199 : vector<16x12xf32>
    %201 = vector.extract_strided_slice %37 {offsets = [0, 38], sizes = [16, 1], strides = [1, 1]} : vector<16x64xf32> to vector<16x1xf32>
    %202 = vector.broadcast %201 : vector<16x1xf32> to vector<16x12xf32>
    %203 = arith.mulf %202, %51 : vector<16x12xf32>
    %204 = arith.addf %200, %203 : vector<16x12xf32>
    %205 = vector.extract_strided_slice %37 {offsets = [0, 39], sizes = [16, 1], strides = [1, 1]} : vector<16x64xf32> to vector<16x1xf32>
    %206 = vector.broadcast %205 : vector<16x1xf32> to vector<16x12xf32>
    %207 = arith.mulf %206, %53 : vector<16x12xf32>
    %208 = arith.addf %204, %207 : vector<16x12xf32>
    %209 = vector.extract_strided_slice %37 {offsets = [0, 40], sizes = [16, 1], strides = [1, 1]} : vector<16x64xf32> to vector<16x1xf32>
    %210 = vector.broadcast %209 : vector<16x1xf32> to vector<16x12xf32>
    %211 = arith.mulf %210, %39 : vector<16x12xf32>
    %212 = vector.extract_strided_slice %37 {offsets = [0, 41], sizes = [16, 1], strides = [1, 1]} : vector<16x64xf32> to vector<16x1xf32>
    %213 = vector.broadcast %212 : vector<16x1xf32> to vector<16x12xf32>
    %214 = arith.mulf %213, %41 : vector<16x12xf32>
    %215 = arith.addf %211, %214 : vector<16x12xf32>
    %216 = vector.extract_strided_slice %37 {offsets = [0, 42], sizes = [16, 1], strides = [1, 1]} : vector<16x64xf32> to vector<16x1xf32>
    %217 = vector.broadcast %216 : vector<16x1xf32> to vector<16x12xf32>
    %218 = arith.mulf %217, %43 : vector<16x12xf32>
    %219 = arith.addf %215, %218 : vector<16x12xf32>
    %220 = vector.extract_strided_slice %37 {offsets = [0, 43], sizes = [16, 1], strides = [1, 1]} : vector<16x64xf32> to vector<16x1xf32>
    %221 = vector.broadcast %220 : vector<16x1xf32> to vector<16x12xf32>
    %222 = arith.mulf %221, %45 : vector<16x12xf32>
    %223 = arith.addf %219, %222 : vector<16x12xf32>
    %224 = vector.extract_strided_slice %37 {offsets = [0, 44], sizes = [16, 1], strides = [1, 1]} : vector<16x64xf32> to vector<16x1xf32>
    %225 = vector.broadcast %224 : vector<16x1xf32> to vector<16x12xf32>
    %226 = arith.mulf %225, %47 : vector<16x12xf32>
    %227 = arith.addf %223, %226 : vector<16x12xf32>
    %228 = vector.extract_strided_slice %37 {offsets = [0, 45], sizes = [16, 1], strides = [1, 1]} : vector<16x64xf32> to vector<16x1xf32>
    %229 = vector.broadcast %228 : vector<16x1xf32> to vector<16x12xf32>
    %230 = arith.mulf %229, %49 : vector<16x12xf32>
    %231 = arith.addf %227, %230 : vector<16x12xf32>
    %232 = vector.extract_strided_slice %37 {offsets = [0, 46], sizes = [16, 1], strides = [1, 1]} : vector<16x64xf32> to vector<16x1xf32>
    %233 = vector.broadcast %232 : vector<16x1xf32> to vector<16x12xf32>
    %234 = arith.mulf %233, %51 : vector<16x12xf32>
    %235 = arith.addf %231, %234 : vector<16x12xf32>
    %236 = vector.extract_strided_slice %37 {offsets = [0, 47], sizes = [16, 1], strides = [1, 1]} : vector<16x64xf32> to vector<16x1xf32>
    %237 = vector.broadcast %236 : vector<16x1xf32> to vector<16x12xf32>
    %238 = arith.mulf %237, %53 : vector<16x12xf32>
    %239 = arith.addf %235, %238 : vector<16x12xf32>
    %240 = vector.extract_strided_slice %37 {offsets = [0, 48], sizes = [16, 1], strides = [1, 1]} : vector<16x64xf32> to vector<16x1xf32>
    %241 = vector.broadcast %240 : vector<16x1xf32> to vector<16x12xf32>
    %242 = arith.mulf %241, %39 : vector<16x12xf32>
    %243 = vector.extract_strided_slice %37 {offsets = [0, 49], sizes = [16, 1], strides = [1, 1]} : vector<16x64xf32> to vector<16x1xf32>
    %244 = vector.broadcast %243 : vector<16x1xf32> to vector<16x12xf32>
    %245 = arith.mulf %244, %41 : vector<16x12xf32>
    %246 = arith.addf %242, %245 : vector<16x12xf32>
    %247 = vector.extract_strided_slice %37 {offsets = [0, 50], sizes = [16, 1], strides = [1, 1]} : vector<16x64xf32> to vector<16x1xf32>
    %248 = vector.broadcast %247 : vector<16x1xf32> to vector<16x12xf32>
    %249 = arith.mulf %248, %43 : vector<16x12xf32>
    %250 = arith.addf %246, %249 : vector<16x12xf32>
    %251 = vector.extract_strided_slice %37 {offsets = [0, 51], sizes = [16, 1], strides = [1, 1]} : vector<16x64xf32> to vector<16x1xf32>
    %252 = vector.broadcast %251 : vector<16x1xf32> to vector<16x12xf32>
    %253 = arith.mulf %252, %45 : vector<16x12xf32>
    %254 = arith.addf %250, %253 : vector<16x12xf32>
    %255 = vector.extract_strided_slice %37 {offsets = [0, 52], sizes = [16, 1], strides = [1, 1]} : vector<16x64xf32> to vector<16x1xf32>
    %256 = vector.broadcast %255 : vector<16x1xf32> to vector<16x12xf32>
    %257 = arith.mulf %256, %47 : vector<16x12xf32>
    %258 = arith.addf %254, %257 : vector<16x12xf32>
    %259 = vector.extract_strided_slice %37 {offsets = [0, 53], sizes = [16, 1], strides = [1, 1]} : vector<16x64xf32> to vector<16x1xf32>
    %260 = vector.broadcast %259 : vector<16x1xf32> to vector<16x12xf32>
    %261 = arith.mulf %260, %49 : vector<16x12xf32>
    %262 = arith.addf %258, %261 : vector<16x12xf32>
    %263 = vector.extract_strided_slice %37 {offsets = [0, 54], sizes = [16, 1], strides = [1, 1]} : vector<16x64xf32> to vector<16x1xf32>
    %264 = vector.broadcast %263 : vector<16x1xf32> to vector<16x12xf32>
    %265 = arith.mulf %264, %51 : vector<16x12xf32>
    %266 = arith.addf %262, %265 : vector<16x12xf32>
    %267 = vector.extract_strided_slice %37 {offsets = [0, 55], sizes = [16, 1], strides = [1, 1]} : vector<16x64xf32> to vector<16x1xf32>
    %268 = vector.broadcast %267 : vector<16x1xf32> to vector<16x12xf32>
    %269 = arith.mulf %268, %53 : vector<16x12xf32>
    %270 = arith.addf %266, %269 : vector<16x12xf32>
    %271 = vector.extract_strided_slice %37 {offsets = [0, 56], sizes = [16, 1], strides = [1, 1]} : vector<16x64xf32> to vector<16x1xf32>
    %272 = vector.broadcast %271 : vector<16x1xf32> to vector<16x12xf32>
    %273 = arith.mulf %272, %39 : vector<16x12xf32>
    %274 = vector.extract_strided_slice %37 {offsets = [0, 57], sizes = [16, 1], strides = [1, 1]} : vector<16x64xf32> to vector<16x1xf32>
    %275 = vector.broadcast %274 : vector<16x1xf32> to vector<16x12xf32>
    %276 = arith.mulf %275, %41 : vector<16x12xf32>
    %277 = arith.addf %273, %276 : vector<16x12xf32>
    %278 = vector.extract_strided_slice %37 {offsets = [0, 58], sizes = [16, 1], strides = [1, 1]} : vector<16x64xf32> to vector<16x1xf32>
    %279 = vector.broadcast %278 : vector<16x1xf32> to vector<16x12xf32>
    %280 = arith.mulf %279, %43 : vector<16x12xf32>
    %281 = arith.addf %277, %280 : vector<16x12xf32>
    %282 = vector.extract_strided_slice %37 {offsets = [0, 59], sizes = [16, 1], strides = [1, 1]} : vector<16x64xf32> to vector<16x1xf32>
    %283 = vector.broadcast %282 : vector<16x1xf32> to vector<16x12xf32>
    %284 = arith.mulf %283, %45 : vector<16x12xf32>
    %285 = arith.addf %281, %284 : vector<16x12xf32>
    %286 = vector.extract_strided_slice %37 {offsets = [0, 60], sizes = [16, 1], strides = [1, 1]} : vector<16x64xf32> to vector<16x1xf32>
    %287 = vector.broadcast %286 : vector<16x1xf32> to vector<16x12xf32>
    %288 = arith.mulf %287, %47 : vector<16x12xf32>
    %289 = arith.addf %285, %288 : vector<16x12xf32>
    %290 = vector.extract_strided_slice %37 {offsets = [0, 61], sizes = [16, 1], strides = [1, 1]} : vector<16x64xf32> to vector<16x1xf32>
    %291 = vector.broadcast %290 : vector<16x1xf32> to vector<16x12xf32>
    %292 = arith.mulf %291, %49 : vector<16x12xf32>
    %293 = arith.addf %289, %292 : vector<16x12xf32>
    %294 = vector.extract_strided_slice %37 {offsets = [0, 62], sizes = [16, 1], strides = [1, 1]} : vector<16x64xf32> to vector<16x1xf32>
    %295 = vector.broadcast %294 : vector<16x1xf32> to vector<16x12xf32>
    %296 = arith.mulf %295, %51 : vector<16x12xf32>
    %297 = arith.addf %293, %296 : vector<16x12xf32>
    %298 = vector.extract_strided_slice %37 {offsets = [0, 63], sizes = [16, 1], strides = [1, 1]} : vector<16x64xf32> to vector<16x1xf32>
    %299 = vector.broadcast %298 : vector<16x1xf32> to vector<16x12xf32>
    %300 = arith.mulf %299, %53 : vector<16x12xf32>
    %301 = arith.addf %297, %300 : vector<16x12xf32>
    %302 = tpu.concatenate %84, %115, %146, %177, %208, %239, %270, %301 in 1 : vector<16x12xf32>, vector<16x12xf32>, vector<16x12xf32>, vector<16x12xf32>, vector<16x12xf32>, vector<16x12xf32>, vector<16x12xf32>, vector<16x12xf32> -> vector<16x96xf32>
    %c0_33 = arith.constant 0 : index
    %c0_34 = arith.constant 0 : index
    %303 = vector.load %arg14[%c0_33, %c0_34] : memref<96x16xf32, #tpu.memory_space<vmem>>, vector<96x16xf32>
    %cst_35 = arith.constant dense<0.000000e+00> : vector<16x16xf32>
    %304 = tpu.matmul %302, %303, %cst_35 {dimension_numbers = #tpu.dot_dimension_numbers<[1], [0], [0], [1], [0, 0, 1, 1], [], []>} : vector<16x96xf32>, vector<96x16xf32>, vector<16x16xf32> -> vector<16x16xf32>
    %c0_36 = arith.constant 0 : index
    %c0_37 = arith.constant 0 : index
    %305 = vector.load %arg15[%c0_36, %c0_37] : memref<1x16xf32, #tpu.memory_space<vmem>>, vector<1x16xf32>
    %306 = vector.broadcast %305 : vector<1x16xf32> to vector<16x16xf32>
    %307 = arith.addf %304, %306 : vector<16x16xf32>
    %cst_38 = arith.constant 0.000000e+00 : f32
    %308 = vector.broadcast %cst_38 : f32 to vector<16x16xf32>
    %309 = arith.maximumf %307, %308 : vector<16x16xf32>
    %c0_39 = arith.constant 0 : index
    %c0_40 = arith.constant 0 : index
    %310 = vector.load %arg16[%c0_39, %c0_40] : memref<16x16xf32, #tpu.memory_space<vmem>>, vector<16x16xf32>
    tpu.vector_store %arg16[%c0_39, %c0_40], %309 {strides = array<i32>} : memref<16x16xf32, #tpu.memory_space<vmem>>, vector<16x16xf32>,
    %c16_i32 = arith.constant 16 : i32
    %311 = arith.muli %arg0, %c16_i32 : i32
    %312 = tpu.iota {dimensions = array<i32: 0>} : vector<16x1xi32>
    %313 = vector.broadcast %311 : i32 to vector<16x1xi32>
    %314 = arith.addi %312, %313 : vector<16x1xi32>
    %c16_i32_41 = arith.constant 16 : i32
    %315 = vector.broadcast %c16_i32_41 : i32 to vector<16x1xi32>
    %316 = arith.cmpi slt, %314, %315 : vector<16x1xi32>
    %317 = arith.extui %316 : vector<16x1xi1> to vector<16x1xi32>
    %318 = arith.sitofp %317 : vector<16x1xi32> to vector<16x1xf32>
    %319 = vector.broadcast %318 : vector<16x1xf32> to vector<16x16xf32>
    %320 = arith.mulf %309, %319 : vector<16x16xf32>
    %cst_42 = arith.constant dense<0.000000e+00> : vector<16xf32>
    %321 = vector.multi_reduction <add>, %320, %cst_42 [0] : vector<16x16xf32> to vector<16xf32>
    %322 = vector.shape_cast %321 : vector<16xf32> to vector<1x16xf32>
    %c0_43 = arith.constant 0 : index
    %c0_44 = arith.constant 0 : index
    %c0_45 = arith.constant 0 : index
    %323 = vector.load %arg17[%c0_43, %c0_44, %c0_45] : memref<1x1x16xf32, #tpu.memory_space<vmem>>, vector<1x1x16xf32>
    %324 = vector.shape_cast %323 : vector<1x1x16xf32> to vector<1x16xf32>
    %325 = vector.shape_cast %322 : vector<1x16xf32> to vector<1x1x16xf32>
    tpu.vector_store %arg17[%c0_43, %c0_44, %c0_45], %325 {strides = array<i32>} : memref<1x1x16xf32, #tpu.memory_space<vmem>>, vector<1x1x16xf32>,
    %326 = arith.mulf %320, %320 : vector<16x16xf32>
    %cst_46 = arith.constant dense<0.000000e+00> : vector<16xf32>
    %327 = vector.multi_reduction <add>, %326, %cst_46 [0] : vector<16x16xf32> to vector<16xf32>
    %328 = vector.shape_cast %327 : vector<16xf32> to vector<1x16xf32>
    %c0_47 = arith.constant 0 : index
    %c0_48 = arith.constant 0 : index
    %c0_49 = arith.constant 0 : index
    %329 = vector.load %arg18[%c0_47, %c0_48, %c0_49] : memref<1x1x16xf32, #tpu.memory_space<vmem>>, vector<1x1x16xf32>
    %330 = vector.shape_cast %329 : vector<1x1x16xf32> to vector<1x16xf32>
    %331 = vector.shape_cast %328 : vector<1x16xf32> to vector<1x1x16xf32>
    tpu.vector_store %arg18[%c0_47, %c0_48, %c0_49], %331 {strides = array<i32>} : memref<1x1x16xf32, #tpu.memory_space<vmem>>, vector<1x1x16xf32>,
    return
  }
  func.func @transform_0(%arg0: i32) -> (i32, i32) {
    %c0_i32 = arith.constant 0 : i32
    %c0_i32_0 = arith.constant 0 : i32
    return %arg0, %c0_i32 : i32, i32
  }
  func.func @transform_1(%arg0: i32) -> (i32, i32) {
    %c0_i32 = arith.constant 0 : i32
    %c0_i32_0 = arith.constant 0 : i32
    return %arg0, %c0_i32 : i32, i32
  }
  func.func @transform_2(%arg0: i32) -> (i32, i32) {
    %c0_i32 = arith.constant 0 : i32
    %c0_i32_0 = arith.constant 0 : i32
    return %arg0, %c0_i32 : i32, i32
  }
  func.func @transform_3(%arg0: i32) -> (i32, i32) {
    %c0_i32 = arith.constant 0 : i32
    %c0_i32_0 = arith.constant 0 : i32
    %c0_i32_1 = arith.constant 0 : i32
    return %c0_i32, %c0_i32_0 : i32, i32
  }
  func.func @transform_4(%arg0: i32) -> (i32, i32) {
    %c0_i32 = arith.constant 0 : i32
    %c0_i32_0 = arith.constant 0 : i32
    %c0_i32_1 = arith.constant 0 : i32
    return %c0_i32, %c0_i32_0 : i32, i32
  }
  func.func @transform_5(%arg0: i32) -> (i32, i32) {
    %c0_i32 = arith.constant 0 : i32
    %c0_i32_0 = arith.constant 0 : i32
    %c0_i32_1 = arith.constant 0 : i32
    return %c0_i32, %c0_i32_0 : i32, i32
  }
  func.func @transform_6(%arg0: i32) -> (i32, i32) {
    %c0_i32 = arith.constant 0 : i32
    %c0_i32_0 = arith.constant 0 : i32
    %c0_i32_1 = arith.constant 0 : i32
    return %c0_i32, %c0_i32_0 : i32, i32
  }
  func.func @transform_7(%arg0: i32) -> (i32, i32) {
    %c0_i32 = arith.constant 0 : i32
    %c0_i32_0 = arith.constant 0 : i32
    %c0_i32_1 = arith.constant 0 : i32
    return %c0_i32, %c0_i32_0 : i32, i32
  }
  func.func @transform_8(%arg0: i32) -> (i32, i32) {
    %c0_i32 = arith.constant 0 : i32
    %c0_i32_0 = arith.constant 0 : i32
    %c0_i32_1 = arith.constant 0 : i32
    return %c0_i32, %c0_i32_0 : i32, i32
  }
  func.func @transform_9(%arg0: i32) -> (i32, i32) {
    %c0_i32 = arith.constant 0 : i32
    %c0_i32_0 = arith.constant 0 : i32
    %c0_i32_1 = arith.constant 0 : i32
    return %c0_i32, %c0_i32_0 : i32, i32
  }
  func.func @transform_10(%arg0: i32) -> (i32, i32) {
    %c0_i32 = arith.constant 0 : i32
    %c0_i32_0 = arith.constant 0 : i32
    %c0_i32_1 = arith.constant 0 : i32
    return %c0_i32, %c0_i32_0 : i32, i32
  }
  func.func @transform_11(%arg0: i32) -> (i32, i32) {
    %c0_i32 = arith.constant 0 : i32
    %c0_i32_0 = arith.constant 0 : i32
    %c0_i32_1 = arith.constant 0 : i32
    return %c0_i32, %c0_i32_0 : i32, i32
  }
  func.func @transform_12(%arg0: i32) -> (i32, i32) {
    %c0_i32 = arith.constant 0 : i32
    %c0_i32_0 = arith.constant 0 : i32
    %c0_i32_1 = arith.constant 0 : i32
    return %c0_i32, %c0_i32_0 : i32, i32
  }
  func.func @transform_13(%arg0: i32) -> (i32, i32) {
    %c0_i32 = arith.constant 0 : i32
    %c0_i32_0 = arith.constant 0 : i32
    %c0_i32_1 = arith.constant 0 : i32
    return %c0_i32, %c0_i32_0 : i32, i32
  }
  func.func @transform_14(%arg0: i32) -> (i32, i32) {
    %c0_i32 = arith.constant 0 : i32
    %c0_i32_0 = arith.constant 0 : i32
    %c0_i32_1 = arith.constant 0 : i32
    return %c0_i32, %c0_i32_0 : i32, i32
  }
  func.func @transform_15(%arg0: i32) -> (i32, i32) {
    %c0_i32 = arith.constant 0 : i32
    %c0_i32_0 = arith.constant 0 : i32
    return %arg0, %c0_i32 : i32, i32
  }
  func.func @transform_16(%arg0: i32) -> (i32, i32, i32) {
    %c0_i32 = arith.constant 0 : i32
    %c0_i32_0 = arith.constant 0 : i32
    %c0_i32_1 = arith.constant 0 : i32
    return %arg0, %c0_i32, %c0_i32_0 : i32, i32, i32
  }
  func.func @transform_17(%arg0: i32) -> (i32, i32, i32) {
    %c0_i32 = arith.constant 0 : i32
    %c0_i32_0 = arith.constant 0 : i32
    %c0_i32_1 = arith.constant 0 : i32
    return %arg0, %c0_i32, %c0_i32_0 : i32, i32, i32
  }
}

</mosaic_0001>

<bundles_post_ra>
// kernel: tpu_custom_call.1
= control target key start
LH: loop header
LB: loop body
LE: loop exit
PB: predicated region body
PF: predicated region fallthrough
CT: control target
= control target key end

     0   :  { %s4006_s0 = inlined_call_operand.vmem [shape: f32[16,24], index: 0, kind: input, shape index: {}]   ;;  %s4007_s1 = inlined_call_operand.vmem [shape: f32[128,3], index: 1, kind: input, shape index: {}]   ;;  %s4008_s2 = inlined_call_operand.vmem [shape: f32[128,8], index: 2, kind: input, shape index: {}]   ;;  %s4009_s3 = inlined_call_operand.vmem [shape: f32[3,4], index: 3, kind: input, shape index: {}]   ;;  %s4010_s4 = inlined_call_operand.vmem [shape: f32[1,4], index: 4, kind: input, shape index: {}]   ;;  %s4011_s5 = inlined_call_operand.vmem [shape: f32[4,4], index: 5, kind: input, shape index: {}]   ;;  %s4012_s6 = inlined_call_operand.vmem [shape: f32[1,4], index: 6, kind: input, shape index: {}]   ;;  %s4013_s7 = inlined_call_operand.vmem [shape: f32[24,64], index: 7, kind: input, shape index: {}]   ;;  %s4014_s8 = inlined_call_operand.vmem [shape: f32[1,64], index: 8, kind: input, shape index: {}]   ;;  %s4015_s9 = inlined_call_operand.vmem [shape: f32[64,64], index: 9, kind: input, shape index: {}]   ;;  %s4016_s10 = inlined_call_operand.vmem [shape: f32[1,64], index: 10, kind: input, shape index: {}]   ;;  %s4017_s11 = inlined_call_operand.vmem [shape: f32[64,64], index: 11, kind: input, shape index: {}]   ;;  %s4018_s12 = inlined_call_operand.vmem [shape: f32[1,64], index: 12, kind: input, shape index: {}]   ;;  %s4019_s13 = inlined_call_operand.vmem [shape: f32[96,16], index: 13, kind: input, shape index: {}]   ;;  %s4020_s14 = inlined_call_operand.vmem [shape: f32[1,16], index: 14, kind: input, shape index: {}]   ;;  %s4021_s15 = inlined_call_operand.hbm [shape: f32[16,16], index: 15, kind: output, shape index: {0}]   ;;  %s4022_s16 = inlined_call_operand.hbm [shape: f32[1,1,16], index: 16, kind: output, shape index: {1}]   ;;  %s4023_s17 = inlined_call_operand.hbm [shape: f32[1,1,16], index: 17, kind: output, shape index: {2}]  }
   0x1   :  { %4051 = sst [smem:[#allocation9_spill]] %s4006_s0 }
   0x2   :  { %4052 = sst [smem:[#allocation10_spill]] %s4007_s1 }
   0x3   :  { %23 = vsyncpa [#allocation3], 0  ;;  %v71_v0 = vld [vmem:[%s4009_s3] sm:$0x7]  ;;  %vm128_vm0 = vcmask 1042432   ;;  %s4053_s28 = sld [smem:[#allocation10_spill]] }
   0x4   :  { %vm79_vm1 = vcmask 23552   ;;  %2303 = vmatprep.subr.msk.mxu0 %vm128_vm0, %v71_v0  ;;  %v615_v3 = vld [vmem:[%s4013_s7 + $0x10] sm:$0xff]  ;;  %v614_v5 = vld [vmem:[%s4013_s7 + $0x8] sm:$0xff]  ;;  %v613_v8 = vld [vmem:[%s4013_s7] sm:$0xff] }
   0x5   :  { %2304 = vmatpush3.msk.msra.mxu0 %vm128_vm0, %v71_v0 }
   0x6   :  { %2355 = vmatprep.subr.mxu0 %v615_v3 }
   0x9   :  { %v55_v1 = vld [vmem:[%s4053_s28] sm:$0xff]  ;;  %v56_v2 = vld [vmem:[%s4053_s28 + $0x8] sm:$0xff]  ;;  %v57_v4 = vld [vmem:[%s4053_s28 + $0x10] sm:$0xff] }
   0xa   :  { %2305 = vmatprep.mubr.msk.f32.mxu0 %vm79_vm1, %v55_v1  ;;  %v58_v6 = vld [vmem:[%s4053_s28 + $0x18] sm:$0xff]  ;;  %v59_v7 = vld [vmem:[%s4053_s28 + $0x20] sm:$0xff] }
   0xb   :  { %2306 = vmatmul.mubr.msk.f32.vlgmr.msra.gmra.mxu0 %vm79_vm1, %v56_v2 }
   0xc   :  { %2356 = vmatpush3.msra.mxu0 %v615_v3  ;;  %2308 = vmatprep.mubr.msk.f32.mxu0 %vm79_vm1, %v57_v4 }
   0xd   :  { %2357 = vmatprep.subr.mxu0 %v614_v5 }
   0xe   :  { %2358 = vmatpush3.msra.mxu0 %v614_v5 }
   0xf   :  { %2309 = vmatmul.mubr.msk.f32.gmra.mxu0 %vm79_vm1, %v58_v6  ;;  %2359 = vmatprep.subr.mxu0 %v613_v8 }
  0x10   :  { %24 = vsyncpa [#allocation5], 0  ;;  %2311 = vmatprep.mubr.msk.f32.mxu0 %vm79_vm1, %v59_v7  ;;  %v60_v9 = vld [vmem:[%s4053_s28 + $0x28] sm:$0xff]  ;;  %2360 = vmatpush3.msra.mxu0 %v613_v8  ;;  %v61_v10 = vld [vmem:[%s4053_s28 + $0x30] sm:$0xff]  ;;  %s4054_s3 = sld [smem:[#allocation9_spill]]  ;;  %vm623_vm2 = vcmask 195584  }
  0x11   :  { %v62_v11 = vld [vmem:[%s4053_s28 + $0x38] sm:$0xff]  ;;  %v63_v12 = vld [vmem:[%s4053_s28 + $0x40] sm:$0xff]  ;;  %v64_v13 = vld [vmem:[%s4053_s28 + $0x48] sm:$0xff]  ;;  %vm350_vm3 = vcmask 1043456   ;;  %s2698_s0 = smov 4   ;;  %vm301_vm4 = vcmask 31744  }
  0x12   :  { %v65_v14 = vld [vmem:[%s4053_s28 + $0x50] sm:$0xff]  ;;  %v66_v15 = vld [vmem:[%s4053_s28 + $0x58] sm:$0xff]  ;;  %v67_v16 = vld [vmem:[%s4053_s28 + $0x60] sm:$0xff]  ;;  %vm722_vm5 = vcmask 523264   ;;  %vm929_vm6 = vcmask 1041409   ;;  %vm932_vm7 = vcmask 1042434  }
  0x13   :  { %2312 = vmatmul.mubr.msk.f32.gmra.mxu0 %vm79_vm1, %v60_v9  ;;  %v68_v17 = vld [vmem:[%s4053_s28 + $0x68] sm:$0xff]  ;;  %v69_v18 = vld [vmem:[%s4053_s28 + $0x70] sm:$0xff]  ;;  %v70_v19 = vld [vmem:[%s4053_s28 + $0x78] sm:$0xff]  ;;  %vm935_vm8 = vcmask 1043459   ;;  %vm938_vm9 = vcmask 1044484   ;;  %vm941_vm10 = vcmask 1045509  }
  0x14   :  { %2314 = vmatprep.mubr.msk.f32.mxu0 %vm79_vm1, %v61_v10  ;;  %v293_v22 = vld [vmem:[%s4011_s5] sm:$0xf]  ;;  %v714_v23 = vld [vmem:[%s4015_s9 + $0x38] sm:$0xff]  ;;  %v517_v25 = vld [vmem:[%s4008_s2 + $0x10] sm:$0xff]  ;;  %vm944_vm11 = vcmask 1046534   ;;  %vm947_vm12 = vcmask 1047559  }
  0x15   :  { %2329 = vmatprep.subr.msk.mxu1 %vm350_vm3, %v293_v22  ;;  %v515_v24 = vld [vmem:[%s4008_s2] sm:$0xff]  ;;  %551 = vrot.lane.b32.xlu1 %v517_v25, %s2698_s0  ;;  %v516_v26 = vld [vmem:[%s4008_s2 + $0x8] sm:$0xff]  ;;  %v518_v27 = vld [vmem:[%s4008_s2 + $0x18] sm:$0xff]  ;;  %s2766_s20 = smov 48   ;;  %s2768_s21 = smov 72   ;;  %vm1975_vm13 = vcmask 97280  }
  0x16   :  { %v611_v20 = vld [vmem:[%s4054_s3] sm:$0xff]  ;;  %v612_v21 = vld [vmem:[%s4054_s3 + $0x8] sm:$0xff]  ;;  %2330 = vmatpush3.msk.msra.mxu1 %vm350_vm3, %v293_v22  ;;  %547 = vrot.lane.b32.xlu0 %v515_v24, %s2698_s0  ;;  %v522_v30 = vld [vmem:[%s4008_s2 + $0x38] sm:$0xff]  ;;  %s2764_s3 = smov 24   ;;  %vm1980_vm14 = vcmask 293888   ;;  %vm1983_vm15 = vcmask 392192  }
  0x17   :  { %2315 = vmatmul.mubr.msk.f32.gmra.mxu0 %vm79_vm1, %v62_v11  ;;  %2364 = vmatprep.subr.mxu1 %v714_v23  ;;  %v520_v28 = vld [vmem:[%s4008_s2 + $0x28] sm:$0xff]  ;;  %v519_v29 = vld [vmem:[%s4008_s2 + $0x20] sm:$0xff]  ;;  %v521_v31 = vld [vmem:[%s4008_s2 + $0x30] sm:$0xff]  ;;  %vm1986_vm0 = vcmask 490496   ;;  %vm1989_vm3 = vcmask 588800   ;;  %s2770_s22 = smov [#allocation2]  }
  0x18   :  { %2317 = vmatprep.mubr.msk.f32.mxu0 %vm79_vm1, %v63_v12  ;;  %v524_v32 = vld [vmem:[%s4008_s2 + $0x48] sm:$0xff]  ;;  %v523_v33 = vld [vmem:[%s4008_s2 + $0x40] sm:$0xff]  ;;  %v526_v34 = vld [vmem:[%s4008_s2 + $0x58] sm:$0xff]  ;;  %s2144_s23 = sshll.u32 %s2770_s22, 4  ;;  %s2145_s23 = int_to_ptr.vmem [resolvable:$true] %s2144_s23 }
  0x19   :  { %553 = vrot.lane.b32.xlu1 %v518_v27, %s2698_s0  ;;  %v525_v35 = vld [vmem:[%s4008_s2 + $0x50] sm:$0xff]  ;;  %v528_v36 = vld [vmem:[%s4008_s2 + $0x68] sm:$0xff]  ;;  %v527_v37 = vld [vmem:[%s4008_s2 + $0x60] sm:$0xff]  ;;  %p2639_p1 = scmp.lt.s32.totalorder %s2145_s23, %s2145_s23 }
  0x1a   :  { %549 = vrot.lane.b32.xlu0 %v516_v26, %s2698_s0  ;;  %v530_v38 = vld [vmem:[%s4008_s2 + $0x78] sm:$0xff]  ;;  %v529_v39 = vld [vmem:[%s4008_s2 + $0x70] sm:$0xff]  ;;  %v3006_v40 = vld [vmem:[%s4010_s4] ss:$0 sm:$0xff] }
  0x1b   :  { %2318 = vmatmul.mubr.msk.f32.gmra.mxu0 %vm79_vm1, %v64_v13  ;;  %v713_v51 = vld [vmem:[%s4015_s9 + $0x30] sm:$0xff]  ;;  %v712_v54 = vld [vmem:[%s4015_s9 + $0x28] sm:$0xff]  ;;  %v711_v59 = vld [vmem:[%s4015_s9 + $0x20] sm:$0xff] }
  0x1c   :  { %2320 = vmatprep.mubr.msk.f32.mxu0 %vm79_vm1, %v65_v14  ;;  %v710_v62 = vld [vmem:[%s4015_s9 + $0x18] sm:$0xff]  ;;  %v709_v3 = vld [vmem:[%s4015_s9 + $0x10] sm:$0xff]  ;;  %v708_v6 = vld [vmem:[%s4015_s9 + $0x8] sm:$0xff] }
  0x1d   :  { %557 = vrot.lane.b32.xlu1 %v520_v28, %s2698_s0  ;;  %v707_v11 = vld [vmem:[%s4015_s9] sm:$0xff]  ;;  %s2765_s9 = smov 36  }
  0x1e   :  { %555 = vrot.lane.b32.xlu0 %v519_v29, %s2698_s0 }
  0x1f   :  { %2321 = vmatmul.mubr.msk.f32.gmra.mxu0 %vm79_vm1, %v66_v15 }
  0x20   :  { %2323 = vmatprep.mubr.msk.f32.mxu0 %vm79_vm1, %v67_v16 }
  0x21   :  { %561 = vrot.lane.b32.xlu1 %v522_v30, %s2698_s0  ;;  %v2218_v30 = vld [vmem:[%s4014_s8] ss:$0 sm:$0xff]  ;;  %s2767_s8 = smov 60  }
  0x22   :  { %559 = vrot.lane.b32.xlu0 %v521_v31, %s2698_s0 }
  0x23   :  { %2324 = vmatmul.mubr.msk.f32.gmra.mxu0 %vm79_vm1, %v68_v17 }
  0x24   :  { %2326 = vmatprep.mubr.msk.f32.mxu0 %vm79_vm1, %v69_v18 }
  0x25   :  { %565 = vrot.lane.b32.xlu1 %v524_v32, %s2698_s0 }
  0x26   :  { %563 = vrot.lane.b32.xlu0 %v523_v33, %s2698_s0 }
  0x27   :  { %2327 = vmatmul.mubr.msk.f32.gmra.mxu0 %vm79_vm1, %v70_v19  ;;  %vm1992_vm1 = vcmask 687104  }
  0x28   :  { %2361 = vmatprep.mubr.msk.f32.mxu0 %vm623_vm2, %v611_v20 }
  0x29   :  { %569 = vrot.lane.b32.xlu1 %v526_v34, %s2698_s0 }
  0x2a   :  { %567 = vrot.lane.b32.xlu0 %v525_v35, %s2698_s0 }
  0x2b   :  { %2362 = vmatmul.mubr.msk.f32.vlgmr.msra.gmra.mxu0 %vm623_vm2, %v612_v21 }
  0x2d   :  { %573 = vrot.lane.b32.xlu1 %v528_v36, %s2698_s0 }
  0x2e   :  { %571 = vrot.lane.b32.xlu0 %v527_v37, %s2698_s0 }
  0x31   :  { %577 = vrot.lane.b32.xlu1 %v530_v38, %s2698_s0 }
  0x32   :  { %575 = vrot.lane.b32.xlu0 %v529_v39, %s2698_s0  ;;  %v813_v39 = vld [vmem:[%s4017_s11 + $0x38] sm:$0xff] }
  0x33   :  { %2383 = vmatprep.subr.mxu0 %v813_v39 }
  0x34   :  { %2384 = vmatpush3.msra.mxu0 %v813_v39 }
  0xcb   :  { %v2307_v41 = vpop.f32.mrf.mxu0 }
  0xcc   :  { %v204_v42 = vadd.f32 %v2307_v41, %v3006_v40  ;;  %v811_v41 = vld [vmem:[%s4017_s11 + $0x28] sm:$0xff] }
  0xcd   :  { %v198_v43 = vpop.f32.mrf.mxu0 }
  0xce   :  { %v199_v44 = vadd.f32 %v3006_v40, %v198_v43  ;;  %v278_v47 = vmax.f32 %v204_v42, 0.0  ;;  %v810_v42 = vld [vmem:[%s4017_s11 + $0x20] sm:$0xff]  ;;  %v809_v43 = vld [vmem:[%s4017_s11 + $0x18] sm:$0xff] }
  0xcf   :  { %v2310_v45 = vpop.f32.mrf.mxu0 }
  0xd0   :  { %v277_v46 = vmax.f32 %v199_v44, 0.0  ;;  %v214_v48 = vadd.f32 %v2310_v45, %v3006_v40  ;;  %v808_v44 = vld [vmem:[%s4017_s11 + $0x10] sm:$0xff]  ;;  %v807_v45 = vld [vmem:[%s4017_s11 + $0x8] sm:$0xff] }
  0xd1   :  { %v208_v49 = vpop.f32.mrf.mxu0 }
  0xd2   :  { %v209_v50 = vadd.f32 %v3006_v40, %v208_v49  ;;  %2331 = vmatprep.mubr.msk.f32.mxu1 %vm301_vm4, %v277_v46  ;;  %v280_v55 = vmax.f32 %v214_v48, 0.0  ;;  %v806_v46 = vld [vmem:[%s4017_s11] sm:$0xff] }
  0xd3   :  { %v2313_v52 = vpop.f32.mrf.mxu0  ;;  %2332 = vmatmul.mubr.msk.f32.vlgmr.msra.gmra.mxu1 %vm301_vm4, %v278_v47  ;;  %v548_v47 = vpop.permute.xlu0 %547  ;;  %v3093_v48 = vld [vmem:[%s4012_s6] ss:$0 sm:$0xff] }
  0xd4   :  { %v279_v53 = vmax.f32 %v209_v50, 0.0  ;;  %2365 = vmatpush3.msra.mxu1 %v714_v23  ;;  %v224_v56 = vadd.f32 %v2313_v52, %v3006_v40 }
  0xd5   :  { %v218_v57 = vpop.f32.mrf.mxu0  ;;  %2366 = vmatprep.subr.mxu1 %v713_v51 }
  0xd6   :  { %v219_v58 = vadd.f32 %v3006_v40, %v218_v57  ;;  %2334 = vmatprep.mubr.msk.f32.mxu1 %vm301_vm4, %v279_v53  ;;  %2367 = vmatpush3.msra.mxu1 %v713_v51  ;;  %v282_v63 = vmax.f32 %v224_v56, 0.0 }
  0xd7   :  { %v2316_v60 = vpop.f32.mrf.mxu0  ;;  %2335 = vmatmul.mubr.msk.f32.gmra.mxu1 %vm301_vm4, %v280_v55  ;;  %2368 = vmatprep.subr.mxu1 %v712_v54  ;;  %v550_v52 = vpop.permute.xlu0 %549 }
  0xd8   :  { %v281_v61 = vmax.f32 %v219_v58, 0.0  ;;  %2369 = vmatpush3.msra.mxu1 %v712_v54  ;;  %v234_v0 = vadd.f32 %v2316_v60, %v3006_v40  ;;  %v552_v55 = vpop.permute.xlu1 %551 }
  0xd9   :  { %v228_v1 = vpop.f32.mrf.mxu0  ;;  %2370 = vmatprep.subr.mxu1 %v711_v59 }
  0xda   :  { %v229_v2 = vadd.f32 %v3006_v40, %v228_v1  ;;  %2337 = vmatprep.mubr.msk.f32.mxu1 %vm301_vm4, %v281_v61  ;;  %2371 = vmatpush3.msra.mxu1 %v711_v59  ;;  %v284_v7 = vmax.f32 %v234_v0, 0.0 }
  0xdb   :  { %v2319_v4 = vpop.f32.mrf.mxu0  ;;  %2338 = vmatmul.mubr.msk.f32.gmra.mxu1 %vm301_vm4, %v282_v63  ;;  %2372 = vmatprep.subr.mxu1 %v710_v62 }
  0xdc   :  { %v283_v5 = vmax.f32 %v229_v2, 0.0  ;;  %2373 = vmatpush3.msra.mxu1 %v710_v62  ;;  %v244_v8 = vadd.f32 %v2319_v4, %v3006_v40 }
  0xdd   :  { %v238_v9 = vpop.f32.mrf.mxu0  ;;  %2374 = vmatprep.subr.mxu1 %v709_v3 }
  0xde   :  { %v239_v10 = vadd.f32 %v3006_v40, %v238_v9  ;;  %2340 = vmatprep.mubr.msk.f32.mxu1 %vm301_vm4, %v283_v5  ;;  %2375 = vmatpush3.msra.mxu1 %v709_v3  ;;  %v286_v14 = vmax.f32 %v244_v8, 0.0 }
  0xdf   :  { %v2322_v12 = vpop.f32.mrf.mxu0  ;;  %2341 = vmatmul.mubr.msk.f32.gmra.mxu1 %vm301_vm4, %v284_v7  ;;  %2376 = vmatprep.subr.mxu1 %v708_v6 }
  0xe0   :  { %v285_v13 = vmax.f32 %v239_v10, 0.0  ;;  %2377 = vmatpush3.msra.mxu1 %v708_v6  ;;  %v254_v15 = vadd.f32 %v2322_v12, %v3006_v40 }
  0xe1   :  { %v248_v16 = vpop.f32.mrf.mxu0  ;;  %2378 = vmatprep.subr.mxu1 %v707_v11 }
  0xe2   :  { %v249_v17 = vadd.f32 %v3006_v40, %v248_v16  ;;  %2343 = vmatprep.mubr.msk.f32.mxu1 %vm301_vm4, %v285_v13  ;;  %2379 = vmatpush3.msra.mxu1 %v707_v11  ;;  %v288_v20 = vmax.f32 %v254_v15, 0.0 }
  0xe3   :  { %v2325_v18 = vpop.f32.mrf.mxu0  ;;  %2344 = vmatmul.mubr.msk.f32.gmra.mxu1 %vm301_vm4, %v286_v14  ;;  %v554_v14 = vpop.permute.xlu1 %553 }
  0xe4   :  { %v287_v19 = vmax.f32 %v249_v17, 0.0  ;;  %v264_v21 = vadd.f32 %v2325_v18, %v3006_v40 }
  0xe5   :  { %v258_v22 = vpop.f32.mrf.mxu0 }
  0xe6   :  { %v259_v23 = vadd.f32 %v3006_v40, %v258_v22  ;;  %2346 = vmatprep.mubr.msk.f32.mxu1 %vm301_vm4, %v287_v19  ;;  %v290_v26 = vmax.f32 %v264_v21, 0.0 }
  0xe7   :  { %v2328_v24 = vpop.f32.mrf.mxu0  ;;  %2347 = vmatmul.mubr.msk.f32.gmra.mxu1 %vm301_vm4, %v288_v20 }
  0xe8   :  { %v289_v25 = vmax.f32 %v259_v23, 0.0  ;;  %v274_v27 = vadd.f32 %v2328_v24, %v3006_v40 }
  0xe9   :  { %v268_v28 = vpop.f32.mrf.mxu0 }
  0xea   :  { %v269_v29 = vadd.f32 %v3006_v40, %v268_v28  ;;  %2349 = vmatprep.mubr.msk.f32.mxu1 %vm301_vm4, %v289_v25  ;;  %v292_v33 = vmax.f32 %v274_v27, 0.0  ;;  %v812_v40 = vld [vmem:[%s4017_s11 + $0x30] sm:$0xff] }
  0xeb   :  { %2350 = vmatmul.mubr.msk.f32.gmra.mxu1 %vm301_vm4, %v290_v26  ;;  %v2363_v31 = vpop.f32.mrf.mxu0  ;;  %2385 = vmatprep.subr.mxu0 %v812_v40 }
  0xec   :  { %v291_v32 = vmax.f32 %v269_v29, 0.0  ;;  %v702_v34 = vadd.f32 %v2363_v31, %v2218_v30  ;;  %2386 = vmatpush3.msra.mxu0 %v812_v40 }
  0xed   :  { %v696_v35 = vpop.f32.mrf.mxu0  ;;  %2387 = vmatprep.subr.mxu0 %v811_v41 }
  0xee   :  { %v697_v36 = vadd.f32 %v2218_v30, %v696_v35  ;;  %2352 = vmatprep.mubr.msk.f32.mxu1 %vm301_vm4, %v291_v32  ;;  %v706_v38 = vmax.f32 %v702_v34, 0.0  ;;  %2388 = vmatpush3.msra.mxu0 %v811_v41 }
  0xef   :  { %2353 = vmatmul.mubr.msk.f32.gmra.mxu1 %vm301_vm4, %v292_v33  ;;  %2389 = vmatprep.subr.mxu0 %v810_v42 }
  0xf0   :  { %v705_v37 = vmax.f32 %v697_v36, 0.0  ;;  %2390 = vmatpush3.msra.mxu0 %v810_v42 }
  0xf1   :  { %2391 = vmatprep.subr.mxu0 %v809_v43 }
  0xf2   :  { %2380 = vmatprep.mubr.msk.f32.mxu1 %vm722_vm5, %v705_v37  ;;  %2392 = vmatpush3.msra.mxu0 %v809_v43 }
  0xf3   :  { %2381 = vmatmul.mubr.msk.f32.vlgmr.msra.gmra.mxu1 %vm722_vm5, %v706_v38  ;;  %2393 = vmatprep.subr.mxu0 %v808_v44 }
  0xf4   :  { %2394 = vmatpush3.msra.mxu0 %v808_v44 }
  0xf5   :  { %2395 = vmatprep.subr.mxu0 %v807_v45 }
  0xf6   :  { %2396 = vmatpush3.msra.mxu0 %v807_v45 }
  0xf7   :  { %2397 = vmatprep.subr.mxu0 %v806_v46 }
  0xf8   :  { %2398 = vmatpush3.msra.mxu0 %v806_v46 }
 0x193   :  { %v2333_v49 = vpop.f32.mrf.mxu1 }
 0x194   :  { %v426_v50 = vadd.f32 %v2333_v49, %v3093_v48 }
 0x195   :  { %v420_v51 = vpop.f32.mrf.mxu1 }
 0x196   :  { %v500_v53 = vmax.f32 %v426_v50, 0.0  ;;  %v421_v54 = vadd.f32 %v3093_v48, %v420_v51 }
 0x197   :  { %v2336_v56 = vpop.f32.mrf.mxu1 }
 0x198   :  { %v499_v57 = vmax.f32 %v421_v54, 0.0  ;;  %v596_v58 = vsel %vm301_vm4, %v500_v53, %v550_v52  ;;  %v436_v59 = vadd.f32 %v2336_v56, %v3093_v48  ;;  %v558_v52 = vpop.permute.xlu1 %557 }
 0x199   :  { %v928_v60 = vrot.slane %v596_v58, 7  ;;  %v1018_v61 = vrot.slane %v596_v58, 1  ;;  %v1060_v62 = vrot.slane %v596_v58, 2  ;;  %v1102_v63 = vrot.slane %v596_v58, 3  ;;  %v430_v0 = vpop.f32.mrf.mxu1 }
 0x19a   :  { %v595_v1 = vsel %vm301_vm4, %v499_v57, %v548_v47  ;;  %v1144_v2 = vrot.slane %v596_v58, 4  ;;  %v1186_v3 = vrot.slane %v596_v58, 5  ;;  %v1228_v4 = vrot.slane %v596_v58, 6 }
 0x19b   :  { %v975_v5 = vrot.slane %v595_v1, 1  ;;  %v1017_v6 = vrot.slane %v595_v1, 2  ;;  %v1059_v7 = vrot.slane %v595_v1, 3  ;;  %v1101_v8 = vrot.slane %v595_v1, 4  ;;  %v2339_v9 = vpop.f32.mrf.mxu1 }
 0x19c   :  { %v1143_v10 = vrot.slane %v595_v1, 5  ;;  %v1185_v11 = vrot.slane %v595_v1, 6  ;;  %v1227_v12 = vrot.slane %v595_v1, 7  ;;  %v930_v13 = vsel %vm929_vm6, %v928_v60, %v595_v1 }
 0x19d   :  { %v976_v15 = vsel %vm929_vm6, %v596_v58, %v975_v5  ;;  %v1019_v16 = vsel %vm929_vm6, %v1018_v61, %v1017_v6  ;;  %v3104_v17 = vsel %vm929_vm6, %v1102_v63, %v1101_v8  ;;  %v502_v18 = vmax.f32 %v436_v59, 0.0  ;;  %v440_v19 = vpop.f32.mrf.mxu1 }
 0x19e   :  { %v1145_v20 = vsel %vm929_vm6, %v1144_v2, %v1143_v10  ;;  %v1187_v21 = vsel %vm929_vm6, %v1186_v3, %v1185_v11  ;;  %v1229_v22 = vsel %vm929_vm6, %v1228_v4, %v1227_v12  ;;  %v431_v23 = vadd.f32 %v3093_v48, %v430_v0  ;;  %v556_v2 = vpop.permute.xlu0 %555 }
 0x19f   :  { %v3111_v24 = vsel %vm301_vm4, %v502_v18, %v554_v14  ;;  %v1061_v25 = vsel %vm929_vm6, %v1060_v62, %v1059_v7  ;;  %v446_v26 = vadd.f32 %v2339_v9, %v3093_v48  ;;  %v441_v27 = vadd.f32 %v3093_v48, %v440_v19  ;;  %v2342_v28 = vpop.f32.mrf.mxu1 }
 0x1a0   :  { %v501_v29 = vmax.f32 %v431_v23, 0.0  ;;  %v934_v30 = vrot.slane %v3111_v24, 5  ;;  %v979_v31 = vrot.slane %v3111_v24, 6  ;;  %v1021_v32 = vrot.slane %v3111_v24, 7 }
 0x1a1   :  { %v1106_v33 = vrot.slane %v3111_v24, 1  ;;  %v1148_v34 = vrot.slane %v3111_v24, 2  ;;  %v1190_v35 = vrot.slane %v3111_v24, 3  ;;  %v1232_v36 = vrot.slane %v3111_v24, 4  ;;  %v3123_v37 = vpop.f32.mrf.mxu1 }
 0x1a2   :  { %v597_v38 = vsel %vm301_vm4, %v501_v29, %v552_v55  ;;  %v504_v39 = vmax.f32 %v446_v26, 0.0  ;;  %v503_v40 = vmax.f32 %v441_v27, 0.0  ;;  %v456_v41 = vadd.f32 %v2342_v28, %v3093_v48 }
 0x1a3   :  { %v931_v42 = vrot.slane %v597_v38, 6  ;;  %v977_v43 = vrot.slane %v597_v38, 7  ;;  %v1020_v44 = vsel %vm932_vm7, %v597_v38, %v1019_v16  ;;  %v1062_v45 = vrot.slane %v597_v38, 1  ;;  %v2345_v46 = vpop.f32.mrf.mxu1 }
 0x1a4   :  { %v1104_v47 = vrot.slane %v597_v38, 2  ;;  %v1146_v49 = vrot.slane %v597_v38, 3  ;;  %v1188_v50 = vrot.slane %v597_v38, 4  ;;  %v1230_v51 = vrot.slane %v597_v38, 5  ;;  %v560_v38 = vpop.permute.xlu0 %559 }
 0x1a5   :  { %v933_v53 = vsel %vm932_vm7, %v931_v42, %v930_v13  ;;  %v978_v54 = vsel %vm932_vm7, %v977_v43, %v976_v15  ;;  %v1022_v55 = vsel %vm935_vm8, %v1021_v32, %v1020_v44  ;;  %v1063_v56 = vsel %vm932_vm7, %v1062_v45, %v1061_v25  ;;  %v460_v57 = vpop.f32.mrf.mxu1  ;;  %v562_v25 = vpop.permute.xlu1 %561 }
 0x1a6   :  { %v936_v58 = vsel %vm935_vm8, %v934_v30, %v933_v53  ;;  %v980_v59 = vsel %vm935_vm8, %v979_v31, %v978_v54  ;;  %v1064_v60 = vsel %vm935_vm8, %v3111_v24, %v1063_v56  ;;  %v1147_v61 = vsel %vm932_vm7, %v1146_v49, %v1145_v20 }
 0x1a7   :  { %v1149_v62 = vsel %vm935_vm8, %v1148_v34, %v1147_v61  ;;  %v1189_v63 = vsel %vm932_vm7, %v1188_v50, %v1187_v21  ;;  %v1231_v0 = vsel %vm932_vm7, %v1230_v51, %v1229_v22  ;;  %v3141_v1 = vsel %vm301_vm4, %v504_v39, %v558_v52  ;;  %v2348_v11 = vpop.f32.mrf.mxu1 }
 0x1a8   :  { %v1191_v3 = vsel %vm935_vm8, %v1190_v35, %v1189_v63  ;;  %v1233_v4 = vsel %vm935_vm8, %v1232_v36, %v1231_v0  ;;  %v940_v5 = vrot.slane %v3141_v1, 3  ;;  %v983_v6 = vrot.slane %v3141_v1, 4 }
 0x1a9   :  { %v1067_v8 = vrot.slane %v3141_v1, 6  ;;  %v1109_v9 = vrot.slane %v3141_v1, 7  ;;  %v1194_v10 = vrot.slane %v3141_v1, 1  ;;  %v506_v13 = vmax.f32 %v456_v41, 0.0  ;;  %v470_v29 = vpop.f32.mrf.mxu1  ;;  %v566_v53 = vpop.permute.xlu1 %565 }
 0x1aa   :  { %v599_v14 = vsel %vm301_vm4, %v503_v40, %v556_v2  ;;  %v1105_v15 = vsel %vm932_vm7, %v1104_v47, %v3104_v17  ;;  %v466_v36 = vadd.f32 %v2345_v46, %v3093_v48  ;;  %v461_v52 = vadd.f32 %v3093_v48, %v460_v57  ;;  %v564_v2 = vpop.permute.xlu0 %563 }
 0x1ab   :  { %v937_v16 = vrot.slane %v599_v14, 4  ;;  %v981_v18 = vrot.slane %v599_v14, 5  ;;  %v1023_v19 = vrot.slane %v599_v14, 6  ;;  %v1065_v20 = vrot.slane %v599_v14, 7  ;;  %v2351_v49 = vpop.f32.mrf.mxu1 }
 0x1ac   :  { %v1107_v21 = vsel %vm935_vm8, %v1106_v33, %v1105_v15  ;;  %v1150_v22 = vrot.slane %v599_v14, 1  ;;  %v1192_v23 = vrot.slane %v599_v14, 2  ;;  %v1234_v24 = vrot.slane %v599_v14, 3 }
 0x1ad   :  { %v3157_v26 = vsel %vm938_vm9, %v937_v16, %v936_v58  ;;  %v3160_v27 = vsel %vm938_vm9, %v981_v18, %v980_v59  ;;  %v3163_v28 = vsel %vm938_vm9, %v1023_v19, %v1022_v55  ;;  %v3166_v17 = vsel %vm938_vm9, %v1065_v20, %v1064_v60 }
 0x1ae   :  { %v1108_v30 = vsel %vm938_vm9, %v599_v14, %v1107_v21  ;;  %v3170_v31 = vsel %vm938_vm9, %v1150_v22, %v1149_v62  ;;  %v3173_v32 = vsel %vm938_vm9, %v1234_v24, %v1233_v4  ;;  %v451_v33 = vadd.f32 %v3093_v48, %v3123_v37  ;;  %v480_v4 = vpop.f32.mrf.mxu1  ;;  %v570_v22 = vpop.permute.xlu1 %569 }
 0x1af   :  { %v3178_v34 = vsel %vm941_vm10, %v1109_v9, %v1108_v30  ;;  %v3181_v35 = vsel %vm301_vm4, %v506_v13, %v562_v25  ;;  %v1193_v39 = vsel %vm938_vm9, %v1192_v23, %v1191_v3  ;;  %v508_v46 = vmax.f32 %v466_v36, 0.0 }
 0x1b0   :  { %v505_v40 = vmax.f32 %v451_v33, 0.0  ;;  %v946_v41 = vrot.slane %v3181_v35, 1  ;;  %v1071_v37 = vrot.slane %v3181_v35, 4  ;;  %v1197_v47 = vrot.slane %v3181_v35, 7 }
 0x1b1   :  { %v1195_v51 = vsel %vm941_vm10, %v1194_v10, %v1193_v39  ;;  %v507_v57 = vmax.f32 %v461_v52, 0.0  ;;  %v604_v63 = vsel %vm301_vm4, %v508_v46, %v566_v53  ;;  %v476_v0 = vadd.f32 %v2348_v11, %v3093_v48 }
 0x1b2   :  { %v3193_v50 = vsel %vm301_vm4, %v505_v40, %v560_v38  ;;  %v471_v3 = vadd.f32 %v3093_v48, %v470_v29  ;;  %v949_v9 = vrot.slane %v604_v63, 7  ;;  %v1032_v10 = vrot.slane %v604_v63, 1 }
 0x1b3   :  { %v943_v54 = vrot.slane %v3193_v50, 2  ;;  %v1069_v58 = vrot.slane %v3193_v50, 5  ;;  %v1111_v59 = vrot.slane %v3193_v50, 6  ;;  %v3205_v61 = vsel %vm944_vm11, %v3193_v50, %v1195_v51 }
 0x1b4   :  { %v1074_v13 = vrot.slane %v604_v63, 2  ;;  %v1116_v14 = vrot.slane %v604_v63, 3  ;;  %v1158_v15 = vrot.slane %v604_v63, 4  ;;  %v1200_v16 = vrot.slane %v604_v63, 5 }
 0x1b5   :  { %v1242_v18 = vrot.slane %v604_v63, 6  ;;  %v510_v19 = vmax.f32 %v476_v0, 0.0  ;;  %v603_v20 = vsel %vm301_vm4, %v507_v57, %v564_v2  ;;  %v509_v21 = vmax.f32 %v471_v3, 0.0 }
 0x1b6   :  { %v486_v23 = vadd.f32 %v2351_v49, %v3093_v48  ;;  %v481_v11 = vadd.f32 %v3093_v48, %v480_v4  ;;  %v950_v24 = vsel %vm929_vm6, %v949_v9, %v603_v20  ;;  %v989_v25 = vrot.slane %v603_v20, 1  ;;  %v568_v49 = vpop.permute.xlu0 %567 }
 0x1b7   :  { %v1031_v29 = vrot.slane %v603_v20, 2  ;;  %v1073_v30 = vrot.slane %v603_v20, 3  ;;  %v1115_v33 = vrot.slane %v603_v20, 4  ;;  %v1157_v36 = vrot.slane %v603_v20, 5 }
 0x1b8   :  { %v1199_v38 = vrot.slane %v603_v20, 6  ;;  %v1241_v39 = vrot.slane %v603_v20, 7  ;;  %v990_v40 = vsel %vm929_vm6, %v604_v63, %v989_v25  ;;  %v3218_v51 = vsel %vm301_vm4, %v510_v19, %v570_v22 }
 0x1b9   :  { %v1075_v46 = vsel %vm929_vm6, %v1074_v13, %v1073_v30  ;;  %v512_v52 = vmax.f32 %v486_v23, 0.0  ;;  %v1117_v53 = vsel %vm929_vm6, %v1116_v14, %v1115_v33  ;;  %v1159_v57 = vsel %vm929_vm6, %v1158_v15, %v1157_v36  ;;  %v2354_v23 = vpop.f32.mrf.mxu1 }
 0x1ba   :  { %v1201_v0 = vsel %vm929_vm6, %v1200_v16, %v1199_v38  ;;  %v1243_v2 = vsel %vm929_vm6, %v1242_v18, %v1241_v39  ;;  %v953_v3 = vrot.slane %v3218_v51, 5  ;;  %v993_v4 = vrot.slane %v3218_v51, 6  ;;  %v574_v38 = vpop.permute.xlu1 %573  ;;  %v572_v62 = vpop.permute.xlu0 %571 }
 0x1bb   :  { %v1035_v63 = vrot.slane %v3218_v51, 7  ;;  %v1120_v9 = vrot.slane %v3218_v51, 1  ;;  %v1162_v13 = vrot.slane %v3218_v51, 2  ;;  %v1204_v19 = vrot.slane %v3218_v51, 3 }
 0x1bc   :  { %v1246_v14 = vrot.slane %v3218_v51, 4  ;;  %v605_v15 = vsel %vm301_vm4, %v509_v21, %v568_v49  ;;  %v1033_v18 = vsel %vm929_vm6, %v1032_v10, %v1031_v29  ;;  %v511_v60 = vmax.f32 %v481_v11, 0.0 }
 0x1bd   :  { %v951_v20 = vrot.slane %v605_v15, 6  ;;  %v991_v16 = vrot.slane %v605_v15, 7  ;;  %v1076_v22 = vrot.slane %v605_v15, 1  ;;  %v1034_v25 = vsel %vm932_vm7, %v605_v15, %v1033_v18 }
 0x1be   :  { %v1118_v30 = vrot.slane %v605_v15, 2  ;;  %v1160_v33 = vrot.slane %v605_v15, 3  ;;  %v1202_v36 = vrot.slane %v605_v15, 4  ;;  %v1036_v43 = vsel %vm935_vm8, %v1035_v63, %v1034_v25  ;;  %v578_v12 = vpop.permute.xlu1 %577 }
 0x1bf   :  { %v952_v39 = vsel %vm932_vm7, %v951_v20, %v950_v24  ;;  %v992_v45 = vsel %vm932_vm7, %v991_v16, %v990_v40  ;;  %v1077_v21 = vsel %vm932_vm7, %v1076_v22, %v1075_v46  ;;  %v1244_v29 = vrot.slane %v605_v15, 5  ;;  %v490_v20 = vpop.f32.mrf.mxu1 }
 0x1c0   :  { %v1161_v49 = vsel %vm932_vm7, %v1160_v33, %v1159_v57  ;;  %v1203_v10 = vsel %vm932_vm7, %v1202_v36, %v1201_v0  ;;  %v3241_v18 = vsel %vm301_vm4, %v512_v52, %v574_v38  ;;  %v496_v56 = vadd.f32 %v2354_v23, %v3093_v48 }
 0x1c1   :  { %v954_v24 = vsel %vm935_vm8, %v953_v3, %v952_v39  ;;  %v994_v40 = vsel %vm935_vm8, %v993_v4, %v992_v45  ;;  %v1245_v63 = vsel %vm932_vm7, %v1244_v29, %v1243_v2  ;;  %v957_v46 = vrot.slane %v3241_v18, 3  ;;  %v2382_v36 = vpop.f32.mrf.mxu1 }
 0x1c2   :  { %v997_v57 = vrot.slane %v3241_v18, 4  ;;  %v1039_v0 = vrot.slane %v3241_v18, 5  ;;  %v1081_v11 = vrot.slane %v3241_v18, 6  ;;  %v1123_v52 = vrot.slane %v3241_v18, 7 }
 0x1c3   :  { %v1208_v15 = vrot.slane %v3241_v18, 1  ;;  %v1250_v16 = vrot.slane %v3241_v18, 2  ;;  %v514_v3 = vmax.f32 %v496_v56, 0.0  ;;  %v607_v45 = vsel %vm301_vm4, %v511_v60, %v572_v62  ;;  %v2221_v56 = vld [vmem:[%s4016_s10] ss:$0 sm:$0xff] }
 0x1c4   :  { %v1078_v2 = vsel %vm935_vm8, %v3218_v51, %v1077_v21  ;;  %v1119_v4 = vsel %vm932_vm7, %v1118_v30, %v1117_v53  ;;  %v955_v22 = vrot.slane %v607_v45, 4  ;;  %v995_v23 = vrot.slane %v607_v45, 5 }
 0x1c5   :  { %v1037_v25 = vrot.slane %v607_v45, 6  ;;  %v1079_v33 = vrot.slane %v607_v45, 7  ;;  %v1121_v38 = vsel %vm935_vm8, %v1120_v9, %v1119_v4  ;;  %v1163_v39 = vsel %vm935_vm8, %v1162_v13, %v1161_v49 }
 0x1c6   :  { %v1164_v29 = vrot.slane %v607_v45, 1  ;;  %v1206_v7 = vrot.slane %v607_v45, 2  ;;  %v956_v60 = vsel %vm938_vm9, %v955_v22, %v954_v24  ;;  %v996_v62 = vsel %vm938_vm9, %v995_v23, %v994_v40  ;;  %v795_v40 = vpop.f32.mrf.mxu1 }
 0x1c7   :  { %v1038_v53 = vsel %vm938_vm9, %v1037_v25, %v1036_v43  ;;  %v1080_v30 = vsel %vm938_vm9, %v1079_v33, %v1078_v2  ;;  %v1122_v21 = vsel %vm938_vm9, %v607_v45, %v1121_v38  ;;  %v1247_v13 = vsel %vm935_vm8, %v1246_v14, %v1245_v63  ;;  %v576_v33 = vpop.permute.xlu0 %575 }
 0x1c8   :  { %v1165_v9 = vsel %vm938_vm9, %v1164_v29, %v1163_v39  ;;  %v1248_v49 = vrot.slane %v607_v45, 3  ;;  %v1124_v4 = vsel %vm941_vm10, %v1123_v52, %v1122_v21  ;;  %v491_v42 = vadd.f32 %v3093_v48, %v490_v20 }
 0x1c9   :  { %v610_v24 = vsel %vm301_vm4, %v514_v3, %v578_v12  ;;  %v801_v22 = vadd.f32 %v2382_v36, %v2221_v56  ;;  %v1205_v48 = vsel %vm935_vm8, %v1204_v19, %v1203_v10  ;;  %v796_v20 = vadd.f32 %v2221_v56, %v795_v40 }
 0x1ca   :  { %v1249_v43 = vsel %vm938_vm9, %v1248_v49, %v1247_v13  ;;  %v961_v23 = vrot.slane %v610_v24, 1  ;;  %v1001_v2 = vrot.slane %v610_v24, 2  ;;  %v1043_v25 = vrot.slane %v610_v24, 3 }
 0x1cb   :  { %v513_v38 = vmax.f32 %v491_v42, 0.0  ;;  %v1085_v39 = vrot.slane %v610_v24, 4  ;;  %v1127_v29 = vrot.slane %v610_v24, 5  ;;  %v1169_v14 = vrot.slane %v610_v24, 6 }
 0x1cc   :  { %v1211_v63 = vrot.slane %v610_v24, 7  ;;  %v805_v45 = vmax.f32 %v801_v22, 0.0  ;;  %v1207_v52 = vsel %vm938_vm9, %v1206_v7, %v1205_v48  ;;  %v998_v3 = vsel %vm941_vm10, %v997_v57, %v996_v62 }
 0x1cd   :  { %v609_v12 = vsel %vm301_vm4, %v513_v38, %v576_v33  ;;  %v958_v36 = vsel %vm941_vm10, %v957_v46, %v956_v60  ;;  %v1209_v22 = vsel %vm941_vm10, %v1208_v15, %v1207_v52  ;;  %v804_v10 = vmax.f32 %v796_v20, 0.0  ;;  %v3417_v52 = vld [vmem:[%s4018_s12] ss:$0 sm:$0xff]  ;;  %s2763_s12 = smov 12  }
 0x1ce   :  { %v959_v21 = vrot.slane %v609_v12, 2  ;;  %v999_v42 = vrot.slane %v609_v12, 3  ;;  %v1041_v13 = vrot.slane %v609_v12, 4  ;;  %v1083_v49 = vrot.slane %v609_v12, 5 }
 0x1cf   :  { %v1125_v44 = vrot.slane %v609_v12, 6  ;;  %v1167_v55 = vrot.slane %v609_v12, 7  ;;  %v1252_v51 = vrot.slane %v609_v12, 1  ;;  %v1210_v19 = vsel %vm944_vm11, %v609_v12, %v1209_v22  ;;  %2399 = vmatprep.mubr.msk.f32.mxu0 %vm722_vm5, %v804_v10 }
 0x1d0   :  { %v1000_v56 = vsel %vm944_vm11, %v999_v42, %v998_v3  ;;  %v960_v7 = vsel %vm944_vm11, %v959_v21, %v958_v36  ;;  %v1040_v15 = vsel %vm941_vm10, %v1039_v0, %v1038_v53  ;;  %2400 = vmatmul.mubr.msk.f32.vlgmr.msra.gmra.mxu0 %vm722_vm5, %v805_v45  ;;  %v1152_v38 = vsel %vm941_vm10, %v3141_v1, %v3170_v31 }
 0x1d1   :  { %v3286_v57 = vsel %vm947_vm12, %v1001_v2, %v1000_v56  ;;  %v3289_v46 = vsel %vm947_vm12, %v961_v23, %v960_v7  ;;  %v1126_v60 = vsel %vm944_vm11, %v1125_v44, %v1124_v4  ;;  %v1042_v40 = vsel %vm944_vm11, %v1041_v13, %v1040_v15 }
 0x1d2   :  { %v3297_v62 = vsel %vm947_vm12, %v1127_v29, %v1126_v60  ;;  %v1251_v2 = vsel %vm941_vm10, %v1250_v16, %v1249_v43  ;;  %v1082_v23 = vsel %vm941_vm10, %v1081_v11, %v1080_v30  ;;  %v3308_v44 = vsel %vm947_vm12, %v1043_v25, %v1042_v40 }
 0x1d3   :  { %v1253_v0 = vsel %vm944_vm11, %v1252_v51, %v1251_v2  ;;  %v1084_v53 = vsel %vm944_vm11, %v1083_v49, %v1082_v23  ;;  %v1166_v4 = vsel %vm941_vm10, %v3241_v18, %v1165_v9  ;;  %v3322_v30 = vsel %vm947_vm12, %v1211_v63, %v1210_v19 }
 0x1d4   :  { %v3315_v33 = vsel %vm947_vm12, %v610_v24, %v1253_v0  ;;  %v3318_v16 = vsel %vm947_vm12, %v1085_v39, %v1084_v53  ;;  %v1168_v11 = vsel %vm944_vm11, %v1167_v55, %v1166_v4  ;;  %v942_v25 = vsel %vm941_vm10, %v940_v5, %v3157_v26 }
 0x1d5   :  { %v3325_v43 = vsel %vm947_vm12, %v1169_v14, %v1168_v11  ;;  %v1068_v18 = vsel %vm941_vm10, %v1067_v8, %v3166_v17  ;;  %v3339_v55 = vsel %vm947_vm12, %v1197_v47, %v3205_v61  ;;  %v945_v9 = vsel %vm944_vm11, %v943_v54, %v942_v25 }
 0x1d6   :  { %v1070_v24 = vsel %vm944_vm11, %v1069_v58, %v1068_v18  ;;  %v984_v5 = vsel %vm941_vm10, %v983_v6, %v3160_v27  ;;  %v1112_v8 = vsel %vm944_vm11, %v1111_v59, %v3178_v34  ;;  %v3358_v26 = vsel %vm947_vm12, %v946_v41, %v945_v9 }
 0x1d7   :  { %v3363_v17 = vsel %vm947_vm12, %v1071_v37, %v1070_v24  ;;  %v4055_v47 = vrot.slane %v3193_v50, 3  ;;  %v4056_v6 = vrot.slane %v3181_v35, 5  ;;  %v4057_v34 = vrot.slane %v3181_v35, 2 }
 0x1d8   :  { %v4058_v41 = vrot.slane %v3141_v1, 2  ;;  %v4059_v59 = vrot.slane %v3141_v1, 5  ;;  %v4060_v39 = vrot.slane %v3193_v50, 1  ;;  %v4061_v14 = vrot.slane %v3193_v50, 4 }
 0x1d9   :  { %v986_v54 = vsel %vm944_vm11, %v4055_v47, %v984_v5  ;;  %v3371_v27 = vsel %vm947_vm12, %v4056_v6, %v1112_v8  ;;  %v4062_v45 = vrot.slane %v3193_v50, 7  ;;  %v4064_v31 = vrot.slane %v3181_v35, 6 }
 0x1da   :  { %v3376_v58 = vsel %vm947_vm12, %v4057_v34, %v986_v54  ;;  %v1237_v37 = vsel %vm941_vm10, %v4058_v41, %v3173_v32  ;;  %v1026_v61 = vsel %vm941_vm10, %v4059_v59, %v3163_v28  ;;  %v4063_v28 = vrot.slane %v3181_v35, 3 }
 0x1db   :  { %v1239_v29 = vsel %vm944_vm11, %v4060_v39, %v1237_v37  ;;  %v1028_v63 = vsel %vm944_vm11, %v4061_v14, %v1026_v61  ;;  %v1154_v32 = vsel %vm944_vm11, %v4062_v45, %v1152_v38  ;;  %v2699_v12 = vmov 1  }
 0x1dc   :  { %v3400_v48 = vsel %vm947_vm12, %v3181_v35, %v1239_v29  ;;  %v3405_v1 = vsel %vm947_vm12, %v4063_v28, %v1028_v63  ;;  %v3410_v20 = vsel %vm947_vm12, %v4064_v31, %v1154_v32  ;;  %2507 = vset.pattern.permute.xlu0 %v2699_v12  ;;  %v2700_v50 = vmov 0  }
 0x1dd   :  { %2506 = vset.pattern.permute.xlu1 %v2700_v50  ;;  %v2701_v35 = vmov 4   ;;  %v2702_v21 = vmov 2   ;;  %v2703_v42 = vmov 7   ;;  %v2704_v13 = vmov 3  }
 0x1de   :  { %v2705_v49 = vmov 10   ;;  %v2706_v22 = vmov 5   ;;  %v2707_v51 = vmov 13   ;;  %v2708_v19 = vmov 6  }
 0x1df   :  { %v2709_v10 = vmov 16   ;;  %v2710_v56 = vmov 8   ;;  %v2711_v7 = vmov 19   ;;  %v2712_v60 = vmov 9  }
 0x1e0   :  { %v2713_v15 = vmov 25   ;;  %v2714_v40 = vmov 11   ;;  %v2715_v2 = vmov 34   ;;  %v2716_v23 = vmov 12  }
 0x1e1   :  { %v4047_v0 = vmov 49   ;;  %v2718_v53 = vmov 14   ;;  %v4046_v4 = vmov 27   ;;  %v2720_v11 = vmov 15  }
 0x1e2   :  { %v2721_v25 = vmov 50   ;;  %v2722_v18 = vmov 17   ;;  %v4029_v9 = vmov 58   ;;  %v2724_v24 = vmov 18  }
 0x1e3   :  { %v4028_v5 = vmov 29   ;;  %v2726_v8 = vmov 20   ;;  %v2727_v47 = vmov 52   ;;  %v2728_v54 = vmov 21  }
 0x1e4   :  { %v2729_v6 = vmov 30   ;;  %v2730_v34 = vmov 24   ;;  %v2731_v41 = vmov 53   ;;  %v4050_v37 = vmov 32  }
 0x1e5   :  { %v4027_v59 = vmov 61   ;;  %v4049_v61 = vmov 33   ;;  %v4026_v38 = vmov 54   ;;  %v2736_v39 = vmov 26  }
 0x1e6   :  { %v2737_v63 = vmov 40   ;;  %v4048_v45 = vmov 41   ;;  %v2739_v32 = vmov 48   ;;  %v4045_v28 = vmov 42  }
 0x1e7   :  { %v4044_v31 = vmov 56   ;;  %vm2014_vm4 = vcmask 785408  }
 0x290   :  { %v2401_v3 = vpop.f32.mrf.mxu0 }
 0x291   :  { %v3420_v36 = vadd.f32 %v2401_v3, %v3417_v52  ;;  %v4030_v3 = vmov 35  }
 0x292   :  { %v893_v29 = vpop.f32.mrf.mxu0 }
 0x293   :  { %972 = vperm.xlu0 %2507, %v3420_v36   ;;  %909 = vperm.xlu1 %2506, %v3420_v36   ;;  %v3497_v14 = vadd.f32 %v3417_v52, %v893_v29 }
 0x297   :  { %2510 = vset.pattern.permute.xlu0 %v2701_v35  ;;  %2508 = vset.pattern.permute.xlu1 %v2702_v21 }
 0x298   :  { %1098 = vperm.xlu0 %2510, %v3420_v36   ;;  %1014 = vperm.xlu1 %2508, %v3420_v36  }
 0x29c   :  { %2513 = vset.pattern.permute.xlu0 %v2703_v42  ;;  %2509 = vset.pattern.permute.xlu1 %v2704_v13 }
 0x29d   :  { %1224 = vperm.xlu0 %2513, %v3420_v36   ;;  %1056 = vperm.xlu1 %2509, %v3420_v36  }
 0x2a1   :  { %2516 = vset.pattern.permute.xlu0 %v2705_v49  ;;  %2511 = vset.pattern.permute.xlu1 %v2706_v22 }
 0x2a2   :  { %1288 = vperm.xlu0 %2516, %v3420_v36   ;;  %1140 = vperm.xlu1 %2511, %v3420_v36  }
 0x2a6   :  { %2519 = vset.pattern.permute.xlu0 %v2707_v51  ;;  %2512 = vset.pattern.permute.xlu1 %v2708_v19 }
 0x2a7   :  { %1324 = vperm.xlu0 %2519, %v3420_v36   ;;  %1182 = vperm.xlu1 %2512, %v3420_v36  }
 0x2ab   :  { %2522 = vset.pattern.permute.xlu0 %v2709_v10  ;;  %2514 = vset.pattern.permute.xlu1 %v2710_v56 }
 0x2ac   :  { %1360 = vperm.xlu0 %2522, %v3420_v36   ;;  %1266 = vperm.xlu1 %2514, %v3420_v36  }
 0x2b0   :  { %2525 = vset.pattern.permute.xlu0 %v2711_v7  ;;  %2515 = vset.pattern.permute.xlu1 %v2712_v60 }
 0x2b1   :  { %1394 = vperm.xlu0 %2525, %v3420_v36   ;;  %1276 = vperm.xlu1 %2515, %v3420_v36  }
 0x2b5   :  { %2529 = vset.pattern.permute.xlu0 %v2713_v15  ;;  %2517 = vset.pattern.permute.xlu1 %v2714_v40 }
 0x2b6   :  { %1464 = vperm.xlu0 %2529, %v3420_v36   ;;  %1300 = vperm.xlu1 %2517, %v3420_v36  }
 0x2ba   :  { %2535 = vset.pattern.permute.xlu0 %v2715_v2  ;;  %2518 = vset.pattern.permute.xlu1 %v2716_v23 }
 0x2bb   :  { %1570 = vperm.xlu0 %2535, %v3420_v36   ;;  %1312 = vperm.xlu1 %2518, %v3420_v36  }
 0x2bf   :  { %2537 = vset.pattern.permute.xlu0 %v4047_v0  ;;  %2520 = vset.pattern.permute.xlu1 %v2718_v53 }
 0x2c0   :  { %1746 = vperm.xlu0 %2537, %v3420_v36   ;;  %1336 = vperm.xlu1 %2520, %v3420_v36  }
 0x2c4   :  { %2538 = vset.pattern.permute.xlu0 %v4046_v4  ;;  %2521 = vset.pattern.permute.xlu1 %v2720_v11 }
 0x2c5   :  { %1488 = vperm.xlu0 %2538, %v3420_v36   ;;  %1348 = vperm.xlu1 %2521, %v3420_v36  }
 0x2c9   :  { %2543 = vset.pattern.permute.xlu0 %v2721_v25  ;;  %2523 = vset.pattern.permute.xlu1 %v2722_v18 }
 0x2ca   :  { %1758 = vperm.xlu0 %2543, %v3420_v36   ;;  %1370 = vperm.xlu1 %2523, %v3420_v36  }
 0x2ce   :  { %2546 = vset.pattern.permute.xlu0 %v4029_v9  ;;  %2524 = vset.pattern.permute.xlu1 %v2724_v24  ;;  %v4042_v9 = vmov 43  }
 0x2cf   :  { %1852 = vperm.xlu0 %2546, %v3420_v36   ;;  %1382 = vperm.xlu1 %2524, %v3420_v36  }
 0x2d3   :  { %2549 = vset.pattern.permute.xlu0 %v4028_v5  ;;  %2526 = vset.pattern.permute.xlu1 %v2726_v8 }
 0x2d4   :  { %1512 = vperm.xlu0 %2549, %v3420_v36   ;;  %1406 = vperm.xlu1 %2526, %v3420_v36  }
 0x2d8   :  { %2554 = vset.pattern.permute.xlu0 %v2727_v47  ;;  %2527 = vset.pattern.permute.xlu1 %v2728_v54 }
 0x2d9   :  { %1782 = vperm.xlu0 %2554, %v3420_v36   ;;  %1418 = vperm.xlu1 %2527, %v3420_v36  }
 0x2dd   :  { %2555 = vset.pattern.permute.xlu0 %v2729_v6  ;;  %2528 = vset.pattern.permute.xlu1 %v2730_v34 }
 0x2de   :  { %1524 = vperm.xlu0 %2555, %v3420_v36   ;;  %1454 = vperm.xlu1 %2528, %v3420_v36  }
 0x2e2   :  { %2560 = vset.pattern.permute.xlu0 %v2731_v41  ;;  %2530 = vset.pattern.permute.xlu1 %v4050_v37 }
 0x2e3   :  { %1794 = vperm.xlu0 %2560, %v3420_v36   ;;  %1548 = vperm.xlu1 %2530, %v3420_v36  }
 0x2e7   :  { %2563 = vset.pattern.permute.xlu0 %v4027_v59  ;;  %2531 = vset.pattern.permute.xlu1 %v4049_v61 }
 0x2e8   :  { %1888 = vperm.xlu0 %2563, %v3420_v36   ;;  %1558 = vperm.xlu1 %2531, %v3420_v36  }
 0x2ec   :  { %2565 = vset.pattern.permute.xlu0 %v4026_v38  ;;  %2532 = vset.pattern.permute.xlu1 %v2736_v39 }
 0x2ed   :  { %1806 = vperm.xlu0 %2565, %v3420_v36   ;;  %1476 = vperm.xlu1 %2532, %v3420_v36  }
 0x2f1   :  { %2569 = vset.pattern.permute.xlu0 %v2700_v50  ;;  %2533 = vset.pattern.permute.xlu1 %v2737_v63  ;;  %v4043_v50 = vmov 57  }
 0x2f2   :  { %1642 = vperm.xlu1 %2533, %v3420_v36   ;;  %904 = vperm.xlu0 %2569, %v3497_v14  }
 0x2f6   :  { %2534 = vset.pattern.permute.xlu1 %v4048_v45  ;;  %2572 = vset.pattern.permute.xlu0 %v2704_v13 }
 0x2f7   :  { %1652 = vperm.xlu1 %2534, %v3420_v36   ;;  %1052 = vperm.xlu0 %2572, %v3497_v14  }
 0x2fb   :  { %2536 = vset.pattern.permute.xlu1 %v2739_v32  ;;  %2575 = vset.pattern.permute.xlu0 %v2708_v19 }
 0x2fc   :  { %1736 = vperm.xlu1 %2536, %v3420_v36   ;;  %1178 = vperm.xlu0 %2575, %v3497_v14  }
 0x300   :  { %2539 = vset.pattern.permute.xlu1 %v4045_v28  ;;  %2578 = vset.pattern.permute.xlu0 %v2712_v60 }
 0x301   :  { %1664 = vperm.xlu1 %2539, %v3420_v36   ;;  %1272 = vperm.xlu0 %2578, %v3497_v14  }
 0x305   :  { %2540 = vset.pattern.permute.xlu1 %v4044_v31  ;;  %2581 = vset.pattern.permute.xlu0 %v2716_v23 }
 0x306   :  { %1830 = vperm.xlu1 %2540, %v3420_v36   ;;  %1308 = vperm.xlu0 %2581, %v3497_v14  }
 0x30a   :  { %2541 = vset.pattern.permute.xlu1 %v4043_v50  ;;  %2584 = vset.pattern.permute.xlu0 %v2720_v11  ;;  %v2744_v11 = vmov 28  }
 0x30b   :  { %1840 = vperm.xlu1 %2541, %v3420_v36   ;;  %1344 = vperm.xlu0 %2584, %v3497_v14  }
 0x30e   :  { %v910_v52 = vpop.permute.xlu1 %909  ;;  %v973_v13 = vpop.permute.xlu0 %972 }
 0x30f   :  { %2542 = vset.pattern.permute.xlu1 %v4030_v3  ;;  %2587 = vset.pattern.permute.xlu0 %v2724_v24  ;;  %v1006_v19 = vmul.f32 %v3286_v57, %v973_v13  ;;  %v966_v60 = vmul.f32 %v3289_v46, %v910_v52  ;;  %v2746_v3 = vmov 36  }
 0x310   :  { %1582 = vperm.xlu1 %2542, %v3420_v36   ;;  %1378 = vperm.xlu0 %2587, %v3497_v14  }
 0x311   :  { %v1008_v24 = vadd.f32 %v1006_v19, %v966_v60 }
 0x313   :  { %v1015_v23 = vpop.permute.xlu1 %1014  ;;  %v1099_v52 = vpop.permute.xlu0 %1098 }
 0x314   :  { %2544 = vset.pattern.permute.xlu1 %v2744_v11  ;;  %2590 = vset.pattern.permute.xlu0 %v2728_v54  ;;  %v1048_v29 = vmul.f32 %v3308_v44, %v1015_v23  ;;  %v1132_v13 = vmul.f32 %v3297_v62, %v1099_v52 }
 0x315   :  { %1500 = vperm.xlu1 %2544, %v3420_v36   ;;  %1414 = vperm.xlu0 %2590, %v3497_v14  }
 0x316   :  { %v1050_v59 = vadd.f32 %v1048_v29, %v1008_v24 }
 0x318   :  { %v1057_v38 = vpop.permute.xlu1 %1056 }
 0x319   :  { %v1090_v5 = vmul.f32 %v3318_v16, %v1057_v38  ;;  %2545 = vset.pattern.permute.xlu1 %v4042_v9  ;;  %2592 = vset.pattern.permute.xlu0 %v2730_v34  ;;  %v1225_v34 = vpop.permute.xlu0 %1224 }
 0x31a   :  { %1676 = vperm.xlu1 %2545, %v3420_v36   ;;  %1450 = vperm.xlu0 %2592, %v3497_v14  }
 0x31b   :  { %v1092_v54 = vadd.f32 %v1090_v5, %v1050_v59  ;;  %v4039_v5 = vmov 51   ;;  %v1258_v59 = vmul.f32 %v3315_v33, %v1225_v34  ;;  %v4035_v34 = vmov 37  }
 0x31d   :  { %v1141_v23 = vpop.permute.xlu1 %1140  ;;  %v1134_v19 = vadd.f32 %v1132_v13, %v1092_v54  ;;  %v2748_v13 = vmov 44  }
 0x31e   :  { %2547 = vset.pattern.permute.xlu1 %v2746_v3  ;;  %2596 = vset.pattern.permute.xlu0 %v2736_v39  ;;  %v1174_v38 = vmul.f32 %v3325_v43, %v1141_v23 }
 0x31f   :  { %1594 = vperm.xlu1 %2547, %v3420_v36   ;;  %1472 = vperm.xlu0 %2596, %v3497_v14  }
 0x320   :  { %v1176_v29 = vadd.f32 %v1174_v38, %v1134_v19  ;;  %v2750_v38 = vmov 22  }
 0x322   :  { %v1183_v60 = vpop.permute.xlu1 %1182 }
 0x323   :  { %v1216_v24 = vmul.f32 %v3322_v30, %v1183_v60  ;;  %2548 = vset.pattern.permute.xlu1 %v4039_v5  ;;  %2597 = vset.pattern.permute.xlu0 %v2737_v63  ;;  %v4036_v63 = vmov 59   ;;  %v4034_v60 = vmov 45  }
 0x324   :  { %1770 = vperm.xlu1 %2548, %v3420_v36   ;;  %1638 = vperm.xlu0 %2597, %v3497_v14  }
 0x325   :  { %v1218_v39 = vadd.f32 %v1216_v24, %v1176_v29  ;;  %v4033_v29 = vmov 60   ;;  %v4031_v24 = vmov 23  }
 0x327   :  { %v3549_v52 = vadd.f32 %v1258_v59, %v1218_v39  ;;  %v1267_v54 = vpop.permute.xlu1 %1266  ;;  %v4032_v59 = vmov 38  }
 0x328   :  { %2550 = vset.pattern.permute.xlu1 %v2748_v13  ;;  %2599 = vset.pattern.permute.xlu0 %v2715_v2 }
 0x329   :  { %1688 = vperm.xlu1 %2550, %v3420_v36   ;;  %1566 = vperm.xlu0 %2599, %v3497_v14  }
 0x32c   :  { %v1277_v23 = vpop.permute.xlu1 %1276 }
 0x32d   :  { %2551 = vset.pattern.permute.xlu1 %v4036_v63  ;;  %2600 = vset.pattern.permute.xlu0 %v2739_v32  ;;  %v1280_v39 = vmul.f32 %v1277_v23, %v3286_v57 }
 0x32e   :  { %1864 = vperm.xlu1 %2551, %v3420_v36   ;;  %1732 = vperm.xlu0 %2600, %v3497_v14  }
 0x331   :  { %v1301_v19 = vpop.permute.xlu1 %1300 }
 0x332   :  { %2552 = vset.pattern.permute.xlu1 %v2750_v38  ;;  %2607 = vset.pattern.permute.xlu0 %v2721_v25 }
 0x333   :  { %1430 = vperm.xlu1 %2552, %v3420_v36   ;;  %1754 = vperm.xlu0 %2607, %v3497_v14  }
 0x336   :  { %v1313_v2 = vpop.permute.xlu1 %1312 }
 0x337   :  { %2553 = vset.pattern.permute.xlu1 %v4035_v34  ;;  %2608 = vset.pattern.permute.xlu0 %v2744_v11  ;;  %v4037_v34 = vmov 46   ;;  %v1316_v23 = vmul.f32 %v1313_v2, %v3297_v62 }
 0x338   :  { %1606 = vperm.xlu1 %2553, %v3420_v36   ;;  %1496 = vperm.xlu0 %2608, %v3497_v14  }
 0x33b   :  { %v1337_v32 = vpop.permute.xlu1 %1336 }
 0x33c   :  { %2556 = vset.pattern.permute.xlu1 %v4034_v60  ;;  %2611 = vset.pattern.permute.xlu0 %v2746_v3 }
 0x33d   :  { %1700 = vperm.xlu1 %2556, %v3420_v36   ;;  %1590 = vperm.xlu0 %2611, %v3497_v14  }
 0x340   :  { %v1349_v25 = vpop.permute.xlu1 %1348 }
 0x341   :  { %2557 = vset.pattern.permute.xlu1 %v4033_v29  ;;  %2614 = vset.pattern.permute.xlu0 %v2748_v13 }
 0x342   :  { %1876 = vperm.xlu1 %2557, %v3420_v36   ;;  %1684 = vperm.xlu0 %2614, %v3497_v14  }
 0x345   :  { %v3571_v11 = vpop.permute.xlu1 %1370 }
 0x346   :  { %2558 = vset.pattern.permute.xlu1 %v4031_v24  ;;  %2617 = vset.pattern.permute.xlu0 %v2727_v47  ;;  %v2756_v47 = vmov 31   ;;  %v1270_v24 = vmul.f32 %v1267_v54, %v3289_v46  ;;  %v1304_v54 = vmul.f32 %v1301_v19, %v3318_v16  ;;  %v2760_v19 = vmov 55  }
 0x347   :  { %1442 = vperm.xlu1 %2558, %v3420_v36   ;;  %1778 = vperm.xlu0 %2617, %v3497_v14  }
 0x34a   :  { %v3577_v3 = vpop.permute.xlu1 %1382 }
 0x34b   :  { %2559 = vset.pattern.permute.xlu1 %v4032_v59  ;;  %2618 = vset.pattern.permute.xlu0 %v2729_v6  ;;  %v1289_v59 = vpop.permute.xlu0 %1288  ;;  %v1282_v6 = vadd.f32 %v1280_v39, %v1270_v24  ;;  %v2758_v24 = vmov 39   ;;  %v1386_v28 = vmul.f32 %v3577_v3, %v3308_v44 }
 0x34c   :  { %1618 = vperm.xlu1 %2559, %v3420_v36   ;;  %1520 = vperm.xlu0 %2618, %v3497_v14   ;;  %v1292_v60 = vmul.f32 %v1289_v59, %v3308_v44 }
 0x34f   :  { %v3584_v13 = vpop.permute.xlu1 %1406  ;;  %v1325_v59 = vpop.permute.xlu0 %1324 }
 0x350   :  { %2561 = vset.pattern.permute.xlu1 %v2756_v47  ;;  %2623 = vset.pattern.permute.xlu0 %v2731_v41  ;;  %v1294_v41 = vadd.f32 %v1292_v60, %v1282_v6  ;;  %v1328_v60 = vmul.f32 %v1325_v59, %v3325_v43  ;;  %v4038_v6 = vmov 47  }
 0x351   :  { %1536 = vperm.xlu1 %2561, %v3420_v36   ;;  %1790 = vperm.xlu0 %2623, %v3497_v14  }
 0x352   :  { %v1306_v39 = vadd.f32 %v1304_v54, %v1294_v41  ;;  %v1340_v41 = vmul.f32 %v1337_v32, %v3322_v30  ;;  %v1352_v54 = vmul.f32 %v1349_v25, %v3315_v33 }
 0x354   :  { %v3590_v29 = vpop.permute.xlu1 %1418 }
 0x355   :  { %2562 = vset.pattern.permute.xlu1 %v4037_v34  ;;  %2624 = vset.pattern.permute.xlu0 %v2756_v47  ;;  %v1318_v47 = vadd.f32 %v1316_v23, %v1306_v39  ;;  %v4041_v23 = vmov 62   ;;  %v4040_v39 = vmov 63  }
 0x356   :  { %1712 = vperm.xlu1 %2562, %v3420_v36   ;;  %1532 = vperm.xlu0 %2624, %v3497_v14  }
 0x357   :  { %v1330_v2 = vadd.f32 %v1328_v60, %v1318_v47  ;;  %v1361_v47 = vpop.permute.xlu0 %1360 }
 0x359   :  { %v3598_v63 = vpop.permute.xlu1 %1454  ;;  %v1342_v59 = vadd.f32 %v1340_v41, %v1330_v2 }
 0x35a   :  { %2564 = vset.pattern.permute.xlu1 %v2758_v24  ;;  %2627 = vset.pattern.permute.xlu0 %v2758_v24  ;;  %v1458_v3 = vmul.f32 %v3598_v63, %v3289_v46  ;;  %v1422_v63 = vmul.f32 %v3590_v29, %v3325_v43 }
 0x35b   :  { %1630 = vperm.xlu1 %2564, %v3420_v36   ;;  %1626 = vperm.xlu0 %2627, %v3497_v14  }
 0x35e   :  { %v3602_v34 = vpop.permute.xlu1 %1548 }
 0x35f   :  { %2566 = vset.pattern.permute.xlu1 %v4038_v6  ;;  %2631 = vset.pattern.permute.xlu0 %v2760_v19  ;;  %v1354_v6 = vadd.f32 %v1352_v54, %v1342_v59 }
 0x360   :  { %1724 = vperm.xlu1 %2566, %v3420_v36   ;;  %1814 = vperm.xlu0 %2631, %v3497_v14  }
 0x363   :  { %v3610_v24 = vpop.permute.xlu1 %1558 }
 0x364   :  { %2567 = vset.pattern.permute.xlu1 %v4041_v23  ;;  %2632 = vset.pattern.permute.xlu0 %v4040_v39 }
 0x365   :  { %1900 = vperm.xlu1 %2567, %v3420_v36   ;;  %1908 = vperm.xlu0 %2632, %v3497_v14  }
 0x368   :  { %v3616_v5 = vpop.permute.xlu1 %1476 }
 0x369   :  { %2568 = vset.pattern.permute.xlu1 %v2760_v19  ;;  %1923 = vrot.lane.b32.xlu0 %v1354_v6, %s2763_s12  ;;  %v1395_v6 = vpop.permute.xlu0 %1394 }
 0x36a   :  { %1818 = vperm.xlu1 %2568, %v3420_v36  }
 0x36d   :  { %v3620_v32 = vpop.permute.xlu1 %1642 }
 0x36e   :  { %2570 = vset.pattern.permute.xlu1 %v2699_v12  ;;  %v1465_v12 = vpop.permute.xlu0 %1464 }
 0x36f   :  { %968 = vperm.xlu1 %2570, %v3497_v14  }
 0x372   :  { %v3624_v25 = vpop.permute.xlu1 %1652  ;;  %v3638_v41 = vpop.permute.xlu0 %1570 }
 0x373   :  { %2571 = vset.pattern.permute.xlu1 %v2702_v21 }
 0x374   :  { %1010 = vperm.xlu1 %2571, %v3497_v14  }
 0x377   :  { %v3628_v60 = vpop.permute.xlu1 %1736 }
 0x378   :  { %2573 = vset.pattern.permute.xlu1 %v2701_v35 }
 0x379   :  { %1094 = vperm.xlu1 %2573, %v3497_v14  }
 0x37c   :  { %v3632_v19 = vpop.permute.xlu1 %1664 }
 0x37d   :  { %2574 = vset.pattern.permute.xlu1 %v2706_v22  ;;  %v3645_v22 = vpop.permute.xlu0 %1746 }
 0x37e   :  { %1136 = vperm.xlu1 %2574, %v3497_v14  }
 0x381   :  { %v1831_v2 = vpop.permute.xlu1 %1830 }
 0x382   :  { %2576 = vset.pattern.permute.xlu1 %v2703_v42  ;;  %v1489_v42 = vpop.permute.xlu0 %1488 }
 0x383   :  { %1220 = vperm.xlu1 %2576, %v3497_v14  }
 0x386   :  { %v1841_v21 = vpop.permute.xlu1 %1840 }
 0x387   :  { %2577 = vset.pattern.permute.xlu1 %v2710_v56  ;;  %v3656_v56 = vpop.permute.xlu0 %1758 }
 0x388   :  { %1262 = vperm.xlu1 %2577, %v3497_v14  }
 0x38b   :  { %v3642_v35 = vpop.permute.xlu1 %1582  ;;  %v1853_v39 = vpop.permute.xlu0 %1852 }
 0x38c   :  { %2579 = vset.pattern.permute.xlu1 %v2705_v49 }
 0x38d   :  { %1284 = vperm.xlu1 %2579, %v3497_v14  }
 0x390   :  { %v3648_v54 = vpop.permute.xlu1 %1500 }
 0x391   :  { %2580 = vset.pattern.permute.xlu1 %v2714_v40 }
 0x392   :  { %1296 = vperm.xlu1 %2580, %v3497_v14  }
 0x395   :  { %v3652_v59 = vpop.permute.xlu1 %1676 }
 0x396   :  { %2582 = vset.pattern.permute.xlu1 %v2707_v51  ;;  %v1513_v51 = vpop.permute.xlu0 %1512 }
 0x397   :  { %1320 = vperm.xlu1 %2582, %v3497_v14  }
 0x39a   :  { %v3658_v49 = vpop.permute.xlu1 %1594 }
 0x39b   :  { %2583 = vset.pattern.permute.xlu1 %v2718_v53  ;;  %v3671_v53 = vpop.permute.xlu0 %1782 }
 0x39c   :  { %1332 = vperm.xlu1 %2583, %v3497_v14  }
 0x39f   :  { %v3662_v23 = vpop.permute.xlu1 %1770  ;;  %v1525_v31 = vpop.permute.xlu0 %1524 }
 0x3a0   :  { %2585 = vset.pattern.permute.xlu1 %v2709_v10  ;;  %v1374_v10 = vmul.f32 %v3571_v11, %v3286_v57 }
 0x3a1   :  { %1356 = vperm.xlu1 %2585, %v3497_v14  }
 0x3a3   :  { %v3687_v61 = vpop.permute.xlu0 %1794 }
 0x3a4   :  { %v3666_v40 = vpop.permute.xlu1 %1688 }
 0x3a5   :  { %2586 = vset.pattern.permute.xlu1 %v2722_v18  ;;  %v1364_v18 = vmul.f32 %v1361_v47, %v3289_v46  ;;  %v1398_v47 = vmul.f32 %v1395_v6, %v3318_v16  ;;  %v1480_v6 = vmul.f32 %v3616_v5, %v3308_v44 }
 0x3a6   :  { %1366 = vperm.xlu1 %2586, %v3497_v14  }
 0x3a7   :  { %v1376_v0 = vadd.f32 %v1374_v10, %v1364_v18  ;;  %v1889_v18 = vpop.permute.xlu0 %1888 }
 0x3a8   :  { %v1892_v5 = vmul.f32 %v1889_v18, %v3325_v43  ;;  %v1552_v18 = vmul.f32 %v3602_v34, %v3289_v46  ;;  %v1656_v34 = vmul.f32 %v3624_v25, %v3286_v57 }
 0x3a9   :  { %v1865_v9 = vpop.permute.xlu1 %1864  ;;  %v1388_v45 = vadd.f32 %v1386_v28, %v1376_v0  ;;  %v1468_v0 = vmul.f32 %v1465_v12, %v3286_v57 }
 0x3aa   :  { %2588 = vset.pattern.permute.xlu1 %v2711_v7  ;;  %v1844_v7 = vmul.f32 %v1841_v21, %v3286_v57  ;;  %v1868_v21 = vmul.f32 %v1865_v9, %v3318_v16 }
 0x3ab   :  { %1390 = vperm.xlu1 %2588, %v3497_v14   ;;  %v1400_v28 = vadd.f32 %v1398_v47, %v1388_v45 }
 0x3ae   :  { %v1431_v50 = vpop.permute.xlu1 %1430 }
 0x3af   :  { %2589 = vset.pattern.permute.xlu1 %v2726_v8  ;;  %v1834_v8 = vmul.f32 %v1831_v2, %v3289_v46  ;;  %v1410_v2 = vmul.f32 %v3584_v13, %v3297_v62  ;;  %v1434_v47 = vmul.f32 %v1431_v50, %v3322_v30 }
 0x3b0   :  { %1402 = vperm.xlu1 %2589, %v3497_v14  }
 0x3b1   :  { %v1846_v11 = vadd.f32 %v1844_v7, %v1834_v8  ;;  %v4065_v8 = vmov 32   ;;  %v1412_v12 = vadd.f32 %v1410_v2, %v1400_v28  ;;  %v4066_v2 = vmov 33  }
 0x3b3   :  { %v3681_v4 = vpop.permute.xlu1 %1606  ;;  %v1424_v29 = vadd.f32 %v1422_v63, %v1412_v12 }
 0x3b4   :  { %2591 = vset.pattern.permute.xlu1 %v2750_v38  ;;  %v1856_v38 = vmul.f32 %v1853_v39, %v3308_v44  ;;  %v1610_v25 = vmul.f32 %v3681_v4, %v3325_v43 }
 0x3b5   :  { %1426 = vperm.xlu1 %2591, %v3497_v14  }
 0x3b6   :  { %v1858_v10 = vadd.f32 %v1856_v38, %v1846_v11  ;;  %v1492_v11 = vmul.f32 %v1489_v42, %v3318_v16  ;;  %v1562_v42 = vmul.f32 %v3610_v24, %v3286_v57  ;;  %v1586_v24 = vmul.f32 %v3642_v35, %v3318_v16 }
 0x3b7   :  { %v1740_v35 = vmul.f32 %v3628_v60, %v3289_v46 }
 0x3b8   :  { %v3689_v37 = vpop.permute.xlu1 %1700  ;;  %v1870_v7 = vadd.f32 %v1868_v21, %v1858_v10  ;;  %v1436_v10 = vadd.f32 %v1434_v47, %v1424_v29  ;;  %v4068_v47 = vmov 49  }
 0x3b9   :  { %2593 = vset.pattern.permute.xlu1 %v2713_v15  ;;  %v1470_v15 = vadd.f32 %v1468_v0, %v1458_v3  ;;  %v1504_v3 = vmul.f32 %v3648_v54, %v3297_v62  ;;  %v4067_v54 = vmov 41  }
 0x3ba   :  { %1460 = vperm.xlu1 %2593, %v3497_v14  }
 0x3bb   :  { %v1482_v45 = vadd.f32 %v1480_v6, %v1470_v15  ;;  %v1516_v15 = vmul.f32 %v1513_v51, %v3325_v43  ;;  %v1574_v51 = vmul.f32 %v3638_v41, %v3308_v44  ;;  %v1646_v41 = vmul.f32 %v3620_v32, %v3289_v46 }
 0x3bc   :  { %v1680_v32 = vmul.f32 %v3652_v59, %v3318_v16  ;;  %v1774_v59 = vmul.f32 %v3662_v23, %v3318_v16  ;;  %v1786_v16 = vmul.f32 %v3671_v53, %v3297_v62 }
 0x3bd   :  { %v1877_v39 = vpop.permute.xlu1 %1876  ;;  %v1494_v0 = vadd.f32 %v1492_v11, %v1482_v45  ;;  %v1668_v11 = vmul.f32 %v3632_v19, %v3308_v44 }
 0x3be   :  { %v1880_v9 = vmul.f32 %v1877_v39, %v3297_v62  ;;  %2594 = vset.pattern.permute.xlu1 %v4065_v8 }
 0x3bf   :  { %1544 = vperm.xlu1 %2594, %v3497_v14   ;;  %v1506_v50 = vadd.f32 %v1504_v3, %v1494_v0  ;;  %v4069_v0 = vmov 27  }
 0x3c0   :  { %v1882_v13 = vadd.f32 %v1880_v9, %v1870_v7  ;;  %v1528_v7 = vmul.f32 %v1525_v31, %v3322_v30  ;;  %v1564_v9 = vadd.f32 %v1562_v42, %v1552_v18  ;;  %v1598_v31 = vmul.f32 %v3658_v49, %v3297_v62 }
 0x3c1   :  { %v1518_v39 = vadd.f32 %v1516_v15, %v1506_v50  ;;  %v1750_v49 = vmul.f32 %v3645_v22, %v3286_v57  ;;  %v1762_v57 = vmul.f32 %v3656_v56, %v3308_v44  ;;  %v4070_v42 = vmov 42  }
 0x3c2   :  { %v1443_v38 = vpop.permute.xlu1 %1442  ;;  %v3713_v21 = vadd.f32 %v1892_v5, %v1882_v13  ;;  %v1576_v5 = vadd.f32 %v1574_v51, %v1564_v9  ;;  %v1798_v51 = vmul.f32 %v3687_v61, %v3325_v43 }
 0x3c3   :  { %v1446_v28 = vmul.f32 %v1443_v38, %v3315_v33  ;;  %2595 = vset.pattern.permute.xlu1 %v4066_v2  ;;  %v1530_v12 = vadd.f32 %v1528_v7, %v1518_v39  ;;  %v1658_v38 = vadd.f32 %v1656_v34, %v1646_v41  ;;  %v1752_v19 = vadd.f32 %v1750_v49, %v1740_v35 }
 0x3c4   :  { %1554 = vperm.xlu1 %2595, %v3497_v14   ;;  %v1588_v29 = vadd.f32 %v1586_v24, %v1576_v5  ;;  %v1704_v2 = vmul.f32 %v3689_v37, %v3325_v43  ;;  %v4071_v7 = vmov 56  }
 0x3c5   :  { %v1448_v6 = vadd.f32 %v1446_v28, %v1436_v10  ;;  %v1670_v4 = vadd.f32 %v1668_v11, %v1658_v38  ;;  %v1692_v10 = vmul.f32 %v3666_v40, %v3297_v62  ;;  %v4074_v11 = vmov 43  }
 0x3c6   :  { %v1600_v46 = vadd.f32 %v1598_v31, %v1588_v29  ;;  %v4073_v31 = vmov 35   ;;  %v4075_v38 = vmov 58  }
 0x3c7   :  { %v1619_v63 = vpop.permute.xlu1 %1618  ;;  %1931 = vrot.lane.b32.xlu0 %v1448_v6, %s2764_s3  ;;  %v1682_v22 = vadd.f32 %v1680_v32, %v1670_v4  ;;  %v4076_v4 = vmov 51  }
 0x3c8   :  { %2598 = vset.pattern.permute.xlu1 %v4067_v54  ;;  %v1622_v60 = vmul.f32 %v1619_v63, %v3322_v30  ;;  %v1612_v28 = vadd.f32 %v1610_v25, %v1600_v46  ;;  %v1764_v63 = vadd.f32 %v1762_v57, %v1752_v19 }
 0x3c9   :  { %1648 = vperm.xlu1 %2598, %v3497_v14   ;;  %v1694_v54 = vadd.f32 %v1692_v10, %v1682_v22 }
 0x3ca   :  { %v1624_v6 = vadd.f32 %v1622_v60, %v1612_v28  ;;  %v1776_v56 = vadd.f32 %v1774_v59, %v1764_v63  ;;  %v4077_v59 = vmov 29   ;;  %v4078_v63 = vmov 59  }
 0x3cb   :  { %v1706_v18 = vadd.f32 %v1704_v2, %v1694_v54 }
 0x3cc   :  { %v1537_v8 = vpop.permute.xlu1 %1536  ;;  %v1788_v9 = vadd.f32 %v1786_v16, %v1776_v56  ;;  %v4081_v16 = vmov 60  }
 0x3cd   :  { %v1540_v45 = vmul.f32 %v1537_v8, %v3315_v33  ;;  %2601 = vset.pattern.permute.xlu1 %v4068_v47 }
 0x3ce   :  { %1742 = vperm.xlu1 %2601, %v3497_v14   ;;  %v1800_v62 = vadd.f32 %v1798_v51, %v1788_v9  ;;  %v4083_v51 = vmov 38  }
 0x3cf   :  { %v1542_v13 = vadd.f32 %v1540_v45, %v1530_v12  ;;  %v1807_v12 = vpop.permute.xlu0 %1806  ;;  %v4072_v45 = vmov 57  }
 0x3d0   :  { %v1810_v53 = vmul.f32 %v1807_v12, %v3322_v30 }
 0x3d1   :  { %v1713_v3 = vpop.permute.xlu1 %1712  ;;  %1939 = vrot.lane.b32.xlu0 %v1542_v13, %s2765_s9 }
 0x3d2   :  { %2602 = vset.pattern.permute.xlu1 %v4069_v0  ;;  %v1716_v40 = vmul.f32 %v1713_v3, %v3322_v30  ;;  %v1812_v34 = vadd.f32 %v1810_v53, %v1800_v62  ;;  %v4084_v62 = vmov 46  }
 0x3d3   :  { %1484 = vperm.xlu1 %2602, %v3497_v14   ;;  %v905_v43 = vpop.permute.xlu0 %904 }
 0x3d4   :  { %v1718_v37 = vadd.f32 %v1716_v40, %v1706_v18  ;;  %v965_v41 = vmul.f32 %v3358_v26, %v905_v43  ;;  %v4080_v18 = vmov 45  }
 0x3d6   :  { %v1631_v50 = vpop.permute.xlu1 %1630 }
 0x3d7   :  { %v1634_v15 = vmul.f32 %v1631_v50, %v3315_v33  ;;  %2603 = vset.pattern.permute.xlu1 %v4070_v42  ;;  %v1053_v25 = vpop.permute.xlu0 %1052 }
 0x3d8   :  { %1660 = vperm.xlu1 %2603, %v3497_v14   ;;  %v1089_v32 = vmul.f32 %v3363_v17, %v1053_v25 }
 0x3d9   :  { %v1636_v44 = vadd.f32 %v1634_v15, %v1624_v6 }
 0x3db   :  { %v1725_v39 = vpop.permute.xlu1 %1724  ;;  %1947 = vrot.lane.b32.xlu0 %v1636_v44, %s2766_s20  ;;  %v1179_v28 = vpop.permute.xlu0 %1178  ;;  %v4079_v44 = vmov 37  }
 0x3dc   :  { %v1728_v23 = vmul.f32 %v1725_v39, %v3315_v33  ;;  %2604 = vset.pattern.permute.xlu1 %v4071_v7  ;;  %v1215_v2 = vmul.f32 %v3339_v55, %v1179_v28  ;;  %v4082_v7 = vmov 23  }
 0x3dd   :  { %1826 = vperm.xlu1 %2604, %v3497_v14  }
 0x3de   :  { %v1730_v8 = vadd.f32 %v1728_v23, %v1718_v37 }
 0x3df   :  { %v1273_v37 = vpop.permute.xlu0 %1272 }
 0x3e0   :  { %v3774_v24 = vpop.permute.xlu1 %1900  ;;  %1955 = vrot.lane.b32.xlu0 %v1730_v8, %s2767_s8 }
 0x3e1   :  { %2605 = vset.pattern.permute.xlu1 %v4072_v45 }
 0x3e2   :  { %1836 = vperm.xlu1 %2605, %v3497_v14  }
 0x3e3   :  { %v1309_v9 = vpop.permute.xlu0 %1308 }
 0x3e4   :  { %v1315_v28 = vmul.f32 %v1309_v9, %v3371_v27 }
 0x3e5   :  { %v1819_v47 = vpop.permute.xlu1 %1818 }
 0x3e6   :  { %v1822_v5 = vmul.f32 %v1819_v47, %v3315_v33  ;;  %2606 = vset.pattern.permute.xlu1 %v4073_v31  ;;  %v4085_v31 = vmov 61  }
 0x3e7   :  { %1578 = vperm.xlu1 %2606, %v3497_v14   ;;  %v1345_v12 = vpop.permute.xlu0 %1344 }
 0x3e8   :  { %v1824_v61 = vadd.f32 %v1822_v5, %v1812_v34 }
 0x3ea   :  { %v969_v13 = vpop.permute.xlu1 %968  ;;  %1963 = vrot.lane.b32.xlu0 %v1824_v61, %s2768_s21 }
 0x3eb   :  { %v1005_v35 = vmul.f32 %v3376_v58, %v969_v13  ;;  %2609 = vset.pattern.permute.xlu1 %v4074_v11  ;;  %v1379_v53 = vpop.permute.xlu0 %1378 }
 0x3ec   :  { %1672 = vperm.xlu1 %2609, %v3497_v14   ;;  %v1385_v61 = vmul.f32 %v1379_v53, %v3405_v1 }
 0x3ed   :  { %v1007_v29 = vadd.f32 %v1005_v35, %v965_v41  ;;  %v1279_v41 = vmul.f32 %v1273_v37, %v3376_v58 }
 0x3ef   :  { %v1011_v3 = vpop.permute.xlu1 %1010 }
 0x3f0   :  { %v1047_v49 = vmul.f32 %v3405_v1, %v1011_v3  ;;  %2610 = vset.pattern.permute.xlu1 %v4075_v38  ;;  %v4086_v38 = vmov 54  }
 0x3f1   :  { %1848 = vperm.xlu1 %2610, %v3497_v14  }
 0x3f2   :  { %v1049_v0 = vadd.f32 %v1047_v49, %v1007_v29 }
 0x3f4   :  { %v1095_v46 = vpop.permute.xlu1 %1094  ;;  %v1091_v60 = vadd.f32 %v1089_v32, %v1049_v0 }
 0x3f5   :  { %v1131_v19 = vmul.f32 %v3371_v27, %v1095_v46  ;;  %2612 = vset.pattern.permute.xlu1 %v4076_v4  ;;  %v1415_v46 = vpop.permute.xlu0 %1414 }
 0x3f6   :  { %1766 = vperm.xlu1 %2612, %v3497_v14  }
 0x3f7   :  { %v1133_v10 = vadd.f32 %v1131_v19, %v1091_v60 }
 0x3f9   :  { %v1137_v57 = vpop.permute.xlu1 %1136 }
 0x3fa   :  { %v1173_v22 = vmul.f32 %v3410_v20, %v1137_v57  ;;  %2613 = vset.pattern.permute.xlu1 %v4077_v59  ;;  %v1421_v57 = vmul.f32 %v1415_v46, %v3410_v20 }
 0x3fb   :  { %1508 = vperm.xlu1 %2613, %v3497_v14  }
 0x3fc   :  { %v1175_v50 = vadd.f32 %v1173_v22, %v1133_v10  ;;  %v4087_v10 = vmov 47  }
 0x3fe   :  { %v1221_v6 = vpop.permute.xlu1 %1220  ;;  %v1217_v15 = vadd.f32 %v1215_v2, %v1175_v50 }
 0x3ff   :  { %v1257_v42 = vmul.f32 %v3400_v48, %v1221_v6  ;;  %2615 = vset.pattern.permute.xlu1 %v4078_v63  ;;  %v4088_v63 = vmov 62  }
 0x400   :  { %1860 = vperm.xlu1 %2615, %v3497_v14  }
 0x401   :  { %v3802_v54 = vadd.f32 %v1257_v42, %v1217_v15 }
 0x403   :  { %v1263_v40 = vpop.permute.xlu1 %1262 }
 0x404   :  { %2616 = vset.pattern.permute.xlu1 %v4079_v44  ;;  %v1269_v43 = vmul.f32 %v1263_v40, %v3358_v26 }
 0x405   :  { %1602 = vperm.xlu1 %2616, %v3497_v14  }
 0x406   :  { %v1281_v25 = vadd.f32 %v1279_v41, %v1269_v43 }
 0x408   :  { %v1285_v56 = vpop.permute.xlu1 %1284 }
 0x409   :  { %2619 = vset.pattern.permute.xlu1 %v4080_v18  ;;  %v1291_v35 = vmul.f32 %v1285_v56, %v3405_v1 }
 0x40a   :  { %1696 = vperm.xlu1 %2619, %v3497_v14  }
 0x40b   :  { %v1293_v32 = vadd.f32 %v1291_v35, %v1281_v25 }
 0x40d   :  { %v1297_v39 = vpop.permute.xlu1 %1296 }
 0x40e   :  { %2620 = vset.pattern.permute.xlu1 %v4081_v16  ;;  %v1303_v3 = vmul.f32 %v1297_v39, %v3363_v17  ;;  %v4089_v39 = vmov 63   ;;  %v1351_v16 = vmul.f32 %v1345_v12, %v3400_v48 }
 0x40f   :  { %1872 = vperm.xlu1 %2620, %v3497_v14  }
 0x410   :  { %v1305_v60 = vadd.f32 %v1303_v3, %v1293_v32 }
 0x412   :  { %v1321_v23 = vpop.permute.xlu1 %1320  ;;  %v1317_v59 = vadd.f32 %v1315_v28, %v1305_v60 }
 0x413   :  { %2621 = vset.pattern.permute.xlu1 %v4082_v7  ;;  %v1327_v2 = vmul.f32 %v1321_v23, %v3410_v20 }
 0x414   :  { %1438 = vperm.xlu1 %2621, %v3497_v14  }
 0x415   :  { %v1329_v40 = vadd.f32 %v1327_v2, %v1317_v59 }
 0x417   :  { %v1333_v8 = vpop.permute.xlu1 %1332 }
 0x418   :  { %2622 = vset.pattern.permute.xlu1 %v4083_v51  ;;  %v1339_v15 = vmul.f32 %v1333_v8, %v3339_v55  ;;  %v1451_v8 = vpop.permute.xlu0 %1450 }
 0x419   :  { %1614 = vperm.xlu1 %2622, %v3497_v14  }
 0x41a   :  { %v1341_v56 = vadd.f32 %v1339_v15, %v1329_v40 }
 0x41c   :  { %v1357_v45 = vpop.permute.xlu1 %1356  ;;  %v1353_v37 = vadd.f32 %v1351_v16, %v1341_v56  ;;  %v1473_v51 = vpop.permute.xlu0 %1472 }
 0x41d   :  { %2625 = vset.pattern.permute.xlu1 %v4084_v62  ;;  %v1363_v34 = vmul.f32 %v1357_v45, %v3358_v26  ;;  %v1479_v60 = vmul.f32 %v1473_v51, %v3405_v1 }
 0x41e   :  { %1708 = vperm.xlu1 %2625, %v3497_v14  }
 0x420   :  { %v3848_v62 = vpop.permute.xlu0 %1638 }
 0x421   :  { %v1367_v47 = vpop.permute.xlu1 %1366 }
 0x422   :  { %v1373_v5 = vmul.f32 %v1367_v47, %v3376_v58  ;;  %2626 = vset.pattern.permute.xlu1 %v4085_v31 }
 0x423   :  { %1884 = vperm.xlu1 %2626, %v3497_v14  }
 0x424   :  { %v1375_v13 = vadd.f32 %v1373_v5, %v1363_v34  ;;  %v1567_v47 = vpop.permute.xlu0 %1566 }
 0x426   :  { %v1391_v11 = vpop.permute.xlu1 %1390  ;;  %v1387_v29 = vadd.f32 %v1385_v61, %v1375_v13 }
 0x427   :  { %v1397_v49 = vmul.f32 %v1391_v11, %v3363_v17  ;;  %2628 = vset.pattern.permute.xlu1 %v4086_v38  ;;  %v1457_v38 = vmul.f32 %v1451_v8, %v3358_v26 }
 0x428   :  { %1802 = vperm.xlu1 %2628, %v3497_v14   ;;  %v3856_v34 = vpop.permute.xlu0 %1732 }
 0x429   :  { %v1399_v0 = vadd.f32 %v1397_v49, %v1387_v29 }
 0x42b   :  { %v1403_v19 = vpop.permute.xlu1 %1402 }
 0x42c   :  { %v1409_v4 = vmul.f32 %v1403_v19, %v3371_v27  ;;  %2629 = vset.pattern.permute.xlu1 %v4087_v10  ;;  %v3858_v31 = vpop.permute.xlu0 %1754 }
 0x42d   :  { %1720 = vperm.xlu1 %2629, %v3497_v14  }
 0x42e   :  { %v1411_v22 = vadd.f32 %v1409_v4, %v1399_v0 }
 0x430   :  { %v1427_v50 = vpop.permute.xlu1 %1426  ;;  %v1423_v6 = vadd.f32 %v1421_v57, %v1411_v22  ;;  %v1497_v61 = vpop.permute.xlu0 %1496 }
 0x431   :  { %v1433_v42 = vmul.f32 %v1427_v50, %v3339_v55  ;;  %2630 = vset.pattern.permute.xlu1 %v4088_v63  ;;  %v1503_v50 = vmul.f32 %v1497_v61, %v3371_v27 }
 0x432   :  { %1896 = vperm.xlu1 %2630, %v3497_v14  }
 0x433   :  { %v3838_v44 = vadd.f32 %v1433_v42, %v1423_v6  ;;  %v1573_v42 = vmul.f32 %v1567_v47, %v3405_v1 }
 0x434   :  { %v1591_v41 = vpop.permute.xlu0 %1590 }
 0x435   :  { %v1461_v18 = vpop.permute.xlu1 %1460 }
 0x436   :  { %2633 = vset.pattern.permute.xlu1 %v4089_v39  ;;  %v1467_v49 = vmul.f32 %v1461_v18, %v3376_v58 }
 0x437   :  { %1912 = vperm.xlu1 %2633, %v3420_v36  }
 0x438   :  { %v3866_v11 = vpop.permute.xlu0 %1684  ;;  %v1469_v46 = vadd.f32 %v1467_v49, %v1457_v38  ;;  %v2003_v38 = vld [vmem:[%s4019_s13 + $0x40] sm:$0xff] }
 0x43a   :  { %v1545_v23 = vpop.permute.xlu1 %1544  ;;  %v1481_v28 = vadd.f32 %v1479_v60, %v1469_v46 }
 0x43b   :  { %1921 = vrot.lane.b32.xlu1 %v1353_v37, %s2763_s12  ;;  %v1551_v57 = vmul.f32 %v1545_v23, %v3358_v26  ;;  %v2006_v23 = vld [vmem:[%s4019_s13 + $0x58] sm:$0xff] }
 0x43c   :  { %v3870_v3 = vpop.permute.xlu0 %1778  ;;  %2402 = vmatprep.subr.mxu1 %v2006_v23 }
 0x43d   :  { %2403 = vmatpush3.msra.mxu1 %v2006_v23  ;;  %v1998_v23 = vld [vmem:[%s4019_s13 + $0x18] sm:$0xff] }
 0x43f   :  { %v1555_v7 = vpop.permute.xlu1 %1554 }
 0x440   :  { %v1521_v0 = vpop.permute.xlu0 %1520  ;;  %v1561_v4 = vmul.f32 %v1555_v7, %v3376_v58  ;;  %v2005_v7 = vld [vmem:[%s4019_s13 + $0x50] sm:$0xff] }
 0x441   :  { %v1527_v8 = vmul.f32 %v1521_v0, %v3339_v55  ;;  %2404 = vmatprep.subr.mxu1 %v2005_v7 }
 0x442   :  { %v1563_v2 = vadd.f32 %v1561_v4, %v1551_v57  ;;  %2405 = vmatpush3.msra.mxu1 %v2005_v7 }
 0x444   :  { %v3844_v9 = vpop.permute.xlu1 %1648  ;;  %v3880_v22 = vpop.permute.xlu0 %1790  ;;  %v1575_v56 = vadd.f32 %v1573_v42, %v1563_v2  ;;  %v1739_v2 = vmul.f32 %v3856_v34, %v3358_v26 }
 0x448   :  { %v1533_v18 = vpop.permute.xlu0 %1532 }
 0x449   :  { %v3846_v14 = vpop.permute.xlu1 %1742  ;;  %v1539_v0 = vmul.f32 %v1533_v18, %v3400_v48 }
 0x44e   :  { %v1485_v45 = vpop.permute.xlu1 %1484 }
 0x44f   :  { %v1491_v19 = vmul.f32 %v1485_v45, %v3363_v17  ;;  %v1597_v45 = vmul.f32 %v1591_v41, %v3371_v27  ;;  %v1627_v41 = vpop.permute.xlu0 %1626 }
 0x450   :  { %v1633_v4 = vmul.f32 %v1627_v41, %v3400_v48  ;;  %v1995_v41 = vld [vmem:[%s4019_s13] sm:$0xff] }
 0x451   :  { %v1493_v59 = vadd.f32 %v1491_v19, %v1481_v28  ;;  %v1749_v28 = vmul.f32 %v3846_v14, %v3376_v58  ;;  %v2000_v14 = vld [vmem:[%s4019_s13 + $0x28] sm:$0xff] }
 0x453   :  { %v3850_v53 = vpop.permute.xlu1 %1660  ;;  %v1505_v40 = vadd.f32 %v1503_v50, %v1493_v59  ;;  %v2001_v59 = vld [vmem:[%s4019_s13 + $0x30] sm:$0xff]  ;;  %v1655_v50 = vmul.f32 %v3844_v9, %v3376_v58  ;;  %v1761_v9 = vmul.f32 %v3858_v31, %v3405_v1 }
 0x458   :  { %v3852_v12 = vpop.permute.xlu1 %1826 }
 0x45d   :  { %v3854_v36 = vpop.permute.xlu1 %1836 }
 0x462   :  { %v1579_v5 = vpop.permute.xlu1 %1578 }
 0x463   :  { %v1585_v63 = vmul.f32 %v1579_v5, %v3363_v17  ;;  %v2004_v5 = vld [vmem:[%s4019_s13 + $0x48] sm:$0xff] }
 0x464   :  { %2406 = vmatprep.subr.mxu1 %v2004_v5 }
 0x465   :  { %v1587_v16 = vadd.f32 %v1585_v63, %v1575_v56  ;;  %2407 = vmatpush3.msra.mxu1 %v2004_v5  ;;  %v1645_v63 = vmul.f32 %v3848_v62, %v3358_v26  ;;  %v1667_v56 = vmul.f32 %v3850_v53, %v3405_v1  ;;  %v1999_v53 = vld [vmem:[%s4019_s13 + $0x20] sm:$0xff] }
 0x466   :  { %2408 = vmatprep.subr.mxu1 %v2003_v38 }
 0x467   :  { %v3860_v43 = vpop.permute.xlu1 %1672  ;;  %v1599_v49 = vadd.f32 %v1597_v45, %v1587_v16  ;;  %2409 = vmatpush3.msra.mxu1 %v2003_v38  ;;  %v1657_v34 = vadd.f32 %v1655_v50, %v1645_v63 }
 0x468   :  { %v1679_v18 = vmul.f32 %v3860_v43, %v3363_v17  ;;  %v1843_v43 = vmul.f32 %v3854_v36, %v3376_v58  ;;  %v1997_v58 = vld [vmem:[%s4019_s13 + $0x10] sm:$0xff]  ;;  %v1996_v36 = vld [vmem:[%s4019_s13 + $0x8] sm:$0xff] }
 0x469   :  { %v1669_v16 = vadd.f32 %v1667_v56, %v1657_v34 }
 0x46b   :  { %v1681_v31 = vadd.f32 %v1679_v18, %v1669_v16 }
 0x46c   :  { %v3862_v13 = vpop.permute.xlu1 %1848 }
 0x46d   :  { %v1855_v5 = vmul.f32 %v3862_v13, %v3405_v1  ;;  %v1797_v1 = vmul.f32 %v3880_v22, %v3410_v20 }
 0x471   :  { %v3864_v35 = vpop.permute.xlu1 %1766 }
 0x476   :  { %v1509_v29 = vpop.permute.xlu1 %1508 }
 0x477   :  { %v1515_v6 = vmul.f32 %v1509_v29, %v3410_v20 }
 0x479   :  { %v1517_v39 = vadd.f32 %v1515_v6, %v1505_v40  ;;  %v1751_v40 = vadd.f32 %v1749_v28, %v1739_v2 }
 0x47b   :  { %v3868_v25 = vpop.permute.xlu1 %1860  ;;  %v1529_v61 = vadd.f32 %v1527_v8, %v1517_v39  ;;  %v1773_v39 = vmul.f32 %v3864_v35, %v3363_v17  ;;  %v1691_v35 = vmul.f32 %v3866_v11, %v3371_v27  ;;  %v1785_v8 = vmul.f32 %v3870_v3, %v3371_v27 }
 0x47d   :  { %v1541_v19 = vadd.f32 %v1539_v0, %v1529_v61  ;;  %v1693_v3 = vadd.f32 %v1691_v35, %v1681_v31 }
 0x480   :  { %v1603_v32 = vpop.permute.xlu1 %1602 }
 0x481   :  { %v1609_v47 = vmul.f32 %v1603_v32, %v3410_v20 }
 0x483   :  { %v1611_v32 = vadd.f32 %v1609_v47, %v1599_v49  ;;  %v1833_v47 = vmul.f32 %v3852_v12, %v3358_v26  ;;  %v1867_v26 = vmul.f32 %v3868_v25, %v3363_v17  ;;  %v1815_v12 = vpop.permute.xlu0 %1814 }
 0x485   :  { %v3877_v10 = vpop.permute.xlu1 %1696  ;;  %v1845_v61 = vadd.f32 %v1843_v43, %v1833_v47 }
 0x487   :  { %v1857_v49 = vadd.f32 %v1855_v5, %v1845_v61 }
 0x489   :  { %v1869_v22 = vadd.f32 %v1867_v26, %v1857_v49 }
 0x48a   :  { %v3884_v15 = vpop.permute.xlu1 %1872 }
 0x48b   :  { %v1879_v38 = vmul.f32 %v3884_v15, %v3371_v27  ;;  %v1821_v27 = vmul.f32 %v1815_v12, %v3400_v48  ;;  %v1909_v15 = vpop.permute.xlu0 %1908 }
 0x48c   :  { %v1915_v50 = vmul.f32 %v1909_v15, %v3400_v48 }
 0x48f   :  { %v1439_v37 = vpop.permute.xlu1 %1438  ;;  %v1924_v56 = vpop.permute.xlu0 %1923 }
 0x490   :  { %v1445_v51 = vmul.f32 %v1439_v37, %v3400_v48  ;;  %v1763_v37 = vadd.f32 %v1761_v9, %v1751_v40 }
 0x492   :  { %v1447_v29 = vadd.f32 %v1445_v51, %v3838_v44  ;;  %v2002_v44 = vld [vmem:[%s4019_s13 + $0x38] sm:$0xff]  ;;  %v1775_v7 = vadd.f32 %v1773_v39, %v1763_v37  ;;  %v1703_v51 = vmul.f32 %v3877_v10, %v3410_v20  ;;  %s2769_s13 = smov 84   ;;  %v1977_v37 = vsel %vm1975_vm13, %v3549_v52, %v1924_v56 }
 0x493   :  { %2410 = vmatprep.subr.mxu1 %v2002_v44 }
 0x494   :  { %v1615_v46 = vpop.permute.xlu1 %1614  ;;  %1929 = vrot.lane.b32.xlu1 %v1447_v29, %s2764_s3  ;;  %2411 = vmatpush3.msra.mxu1 %v2002_v44  ;;  %v1787_v11 = vadd.f32 %v1785_v8, %v1775_v7  ;;  %v1705_v13 = vadd.f32 %v1703_v51, %v1693_v3 }
 0x495   :  { %v1621_v60 = vmul.f32 %v1615_v46, %v3339_v55  ;;  %2412 = vmatprep.subr.mxu1 %v2001_v59 }
 0x496   :  { %2413 = vmatpush3.msra.mxu1 %v2001_v59  ;;  %v1799_v25 = vadd.f32 %v1797_v1, %v1787_v11  ;;  %v1904_v59 = vmul.f32 %v3774_v24, %v3322_v30  ;;  %v1932_v30 = vpop.permute.xlu0 %1931 }
 0x497   :  { %v1623_v57 = vadd.f32 %v1621_v60, %v1611_v32  ;;  %2414 = vmatprep.subr.mxu1 %v2000_v14 }
 0x498   :  { %1937 = vrot.lane.b32.xlu1 %v1541_v19, %s2765_s9  ;;  %2415 = vmatpush3.msra.mxu1 %v2000_v14  ;;  %v1881_v19 = vadd.f32 %v1879_v38, %v1869_v22  ;;  %v1906_v14 = vadd.f32 %v1904_v59, %v3713_v21 }
 0x499   :  { %v1635_v6 = vadd.f32 %v1633_v4, %v1623_v57  ;;  %v1709_v42 = vpop.permute.xlu1 %1708  ;;  %2416 = vmatprep.subr.mxu1 %v1999_v53 }
 0x49a   :  { %2417 = vmatpush3.msra.mxu1 %v1999_v53  ;;  %v1715_v10 = vmul.f32 %v1709_v42, %v3339_v55  ;;  %v1940_v34 = vpop.permute.xlu0 %1939 }
 0x49b   :  { %2418 = vmatprep.subr.mxu1 %v1998_v23 }
 0x49c   :  { %1945 = vrot.lane.b32.xlu1 %v1635_v6, %s2766_s20  ;;  %2419 = vmatpush3.msra.mxu1 %v1998_v23  ;;  %v1717_v17 = vadd.f32 %v1715_v10, %v1705_v13  ;;  %v1979_v23 = vsel %vm623_vm2, %v1977_v37, %v1932_v30 }
 0x49d   :  { %2420 = vmatprep.subr.mxu1 %v1997_v58  ;;  %v1982_v43 = vsel %vm1980_vm14, %v1979_v23, %v1940_v34 }
 0x49e   :  { %v1885_v62 = vpop.permute.xlu1 %1884  ;;  %2421 = vmatpush3.msra.mxu1 %v1997_v58 }
 0x49f   :  { %2422 = vmatprep.subr.mxu1 %v1996_v36  ;;  %v1891_v32 = vmul.f32 %v1885_v62, %v3410_v20 }
 0x4a0   :  { %2423 = vmatpush3.msra.mxu1 %v1996_v36  ;;  %v2227_v36 = vld [vmem:[%s4020_s14] ss:$0 sm:$0xff]  ;;  %s2634_s14 = scalar_lea.vmem %s2145_s23, 256 }
 0x4a1   :  { %2424 = vmatprep.subr.mxu1 %v1995_v41  ;;  %v1893_v28 = vadd.f32 %v1891_v32, %v1881_v19  ;;  %p2635_p0 = scmp.ne.s32.totalorder %s2145_s23, %s2634_s14  ;;  %p2640_p2 = scmp.lt.s32.totalorder %s2634_s14, %s2634_s14 }
 0x4a2   :  { %2425 = vmatpush3.msra.mxu1 %v1995_v41 }
 0x4a3   :  { %v1803_v45 = vpop.permute.xlu1 %1802  ;;  %p2641_p3 = por %p2640_p2, %p2639_p1 }
 0x4a4   :  { %v1809_v29 = vmul.f32 %v1803_v45, %v3339_v55 }
 0x4a5   :  { %p2642_p4 = pnand %p2641_p3, %p2635_p0 }
 0x4a6   :  { %v1811_v60 = vadd.f32 %v1809_v29, %v1799_v25 }
 0x4a8   :  { %v1721_v0 = vpop.permute.xlu1 %1720  ;;  %v1823_v2 = vadd.f32 %v1821_v27, %v1811_v60 }
 0x4a9   :  { %v1727_v46 = vmul.f32 %v1721_v0, %v3400_v48  ;;  %v1948_v48 = vpop.permute.xlu0 %1947 }
 0x4aa   :  { %v1985_v8 = vsel %vm1983_vm15, %v1982_v43, %v1948_v48 }
 0x4ab   :  { %v1729_v44 = vadd.f32 %v1727_v46, %v1717_v17 }
 0x4ad   :  { %v1897_v4 = vpop.permute.xlu1 %1896  ;;  %1953 = vrot.lane.b32.xlu1 %v1729_v44, %s2767_s8  ;;  %v1956_v62 = vpop.permute.xlu0 %1955 }
 0x4ae   :  { %v1903_v57 = vmul.f32 %v1897_v4, %v3339_v55  ;;  %v1988_v45 = vsel %vm1986_vm0, %v1985_v8, %v1956_v62 }
 0x4b0   :  { %v1905_v20 = vadd.f32 %v1903_v57, %v1893_v28 }
 0x4b1   :  { %1961 = vrot.lane.b32.xlu1 %v1823_v2, %s2768_s21  ;;  %v1964_v31 = vpop.permute.xlu0 %1963 }
 0x4b2   :  { %v1917_v6 = vadd.f32 %v1915_v50, %v1905_v20  ;;  %v1913_v42 = vpop.permute.xlu1 %1912  ;;  %v1991_v5 = vsel %vm1989_vm3, %v1988_v45, %v1964_v31 }
 0x4b3   :  { %v1916_v63 = vmul.f32 %v1913_v42, %v3315_v33 }
 0x4b5   :  { %v1918_v40 = vadd.f32 %v1916_v63, %v1906_v14  ;;  %1969 = vrot.lane.b32.xlu1 %v1917_v6, %s2769_s13 }
 0x4b6   :  { %v1922_v55 = vpop.permute.xlu1 %1921 }
 0x4b7   :  { %1971 = vrot.lane.b32.xlu0 %v1918_v40, %s2769_s13  ;;  %v1976_v16 = vsel %vm1975_vm13, %v3802_v54, %v1922_v55 }
 0x506   :  { %v1930_v9 = vpop.permute.xlu1 %1929 }
 0x507   :  { %v1978_v33 = vsel %vm623_vm2, %v1976_v16, %v1930_v9  ;;  %vm2098_vm2 = vcmask 130048  }
 0x50a   :  { %v1938_v24 = vpop.permute.xlu1 %1937 }
 0x50b   :  { %v1981_v53 = vsel %vm1980_vm14, %v1978_v33, %v1938_v24 }
 0x50e   :  { %v1946_v18 = vpop.permute.xlu1 %1945 }
 0x50f   :  { %v1984_v7 = vsel %vm1983_vm15, %v1981_v53, %v1946_v18 }
 0x51f   :  { %v1954_v39 = vpop.permute.xlu1 %1953 }
 0x520   :  { %v1987_v35 = vsel %vm1986_vm0, %v1984_v7, %v1954_v39 }
 0x523   :  { %v1962_v21 = vpop.permute.xlu1 %1961 }
 0x524   :  { %v1990_v54 = vsel %vm1989_vm3, %v1987_v35, %v1962_v21 }
 0x527   :  { %v1970_v51 = vpop.permute.xlu1 %1969 }
 0x528   :  { %v1993_v47 = vsel %vm1992_vm1, %v1990_v54, %v1970_v51 }
 0x529   :  { %v1972_v58 = vpop.permute.xlu0 %1971  ;;  %2426 = vmatprep.mubr.msk.f32.mxu1 %vm2014_vm4, %v1993_v47 }
 0x52a   :  { %v1994_v52 = vsel %vm1992_vm1, %v1991_v5, %v1972_v58 }
 0x52b   :  { %2427 = vmatmul.mubr.msk.f32.vlgmr.msra.gmra.mxu1 %vm2014_vm4, %v1994_v52 }
 0x5eb   :  { %v2428_v11 = vpop.f32.mrf.mxu1 }
 0x5ec   :  { %v2093_v3 = vadd.f32 %v2428_v11, %v2227_v36 }
 0x5ed   :  { %v2087_v10 = vpop.f32.mrf.mxu1 }
 0x5ee   :  { %v2097_v61 = vmax.f32 %v2093_v3, 0.0  ;;  %v2088_v26 = vadd.f32 %v2227_v36, %v2087_v10 }
 0x5f0   :  { %2100 = vst.msk [vmem:[#allocation2 + $0x8] sm:$0xff] %vm2098_vm2, %v2097_v61  ;;  %v2128_v1 = vmul.f32 %v2097_v61, %v2097_v61  ;;  %v2096_v12 = vmax.f32 %v2088_v26, 0.0  ;;  %v2117_v13 = vsel %vm2098_vm2, %v2097_v61, 0.0 }
 0x5f2   :  { %2099 = vst.msk [vmem:[#allocation2] sm:$0xff] %vm2098_vm2, %v2096_v12  ;;  %v2116_v29 = vsel %vm2098_vm2, %v2096_v12, 0.0  ;;  %v2127_v49 = vmul.f32 %v2096_v12, %v2096_v12 }
 0x5f3   :  { %v2118_v38 = vadd.f32 %v2117_v13, %v2116_v29 }
 0x5f4   :  { %2645 = shalt.err (!%p2642_p4)
}
 0x5f5   :  { %s2771_s28 = smov 128   ;;  %s2772_s24 = smov 8   ;;  %v2130_v0 = vsel %vm2098_vm2, %v2128_v1, 0.0  ;;  %v2129_v41 = vsel %vm2098_vm2, %v2127_v49, 0.0  ;;  %v2119_v17 = vrot.slane %v2118_v38, 4  ;;  %vm2125_vm5 = vcmask 122880  }
 0x5f6   :  { %2150 = dma.vmem_to_hbm [thread:$0]  %s2145_s23, 256, %s4021_s15, [#allocation3], %s2771_s28, %s2771_s28, %s2772_s24   ;;  %v2131_v25 = vadd.f32 %v2130_v0, %v2129_v41 }
 0x5f7   :  { %v2120_v46 = vadd.f32 %v2119_v17, %v2118_v38  ;;  %s2773_s0 = smov [#allocation4]   ;;  %s2774_s26 = smov [#allocation6]  }
 0x5f8   :  { %v2132_v22 = vrot.slane %v2131_v25, 4  ;;  %s2157_s25 = sshll.u32 %s2773_s0, 4  ;;  %s2167_s27 = sshll.u32 %s2774_s26, 4  ;;  %s2158_s25 = int_to_ptr.vmem [resolvable:$true] %s2157_s25  ;;  %s2168_s27 = int_to_ptr.vmem [resolvable:$true] %s2167_s27 }
 0x5f9   :  { %v2121_v32 = vrot.slane %v2120_v46, 2  ;;  %s2654_s15 = scalar_lea.vmem %s2158_s25, 16  ;;  %s2658_s29 = scalar_lea.vmem %s2158_s25, 32 }
 0x5fa   :  { %v2133_v60 = vadd.f32 %v2132_v22, %v2131_v25  ;;  %p2655_p5 = scmp.ne.s32.totalorder %s2158_s25, %s2654_s15  ;;  %p2659_p6 = scmp.lt.s32.totalorder %s2158_s25, %s2158_s25 }
 0x5fb   :  { %v2122_v44 = vadd.f32 %v2121_v32, %v2120_v46  ;;  %p2660_p7 = scmp.lt.s32.totalorder %s2658_s29, %s2654_s15 }
 0x5fc   :  { %v2134_v19 = vrot.slane %v2133_v60, 2 }
 0x5fd   :  { %v2123_v27 = vrot.slane %v2122_v44, 1  ;;  %p2661_p8 = por %p2660_p7, %p2659_p6 }
 0x5fe   :  { %v2135_v15 = vadd.f32 %v2134_v19, %v2133_v60 }
 0x5ff   :  { %v2124_v4 = vadd.f32 %v2123_v27, %v2122_v44  ;;  %p2662_p9 = pnand %p2661_p8, %p2655_p5 }
 0x600   :  { %v2136_v28 = vrot.slane %v2135_v15, 1 }
 0x601   :  { %2126 = vst.msk [vmem:[#allocation4] sm:$0x1] %vm2125_vm5, %v2124_v4 }
 0x602   :  { %v2137_v57 = vadd.f32 %v2136_v28, %v2135_v15 }
 0x603   :  { %2665 = shalt.err (!%p2662_p9)
}
 0x604   :  { %2160 = dma.vmem_to_hbm [thread:$0]  %s2158_s25, 16, %s4022_s16, [#allocation5]   ;;  %2138 = vst.msk [vmem:[#allocation6] sm:$0x1] %vm2125_vm5, %v2137_v57 }
 0x605   :  { %s2674_s7 = scalar_lea.vmem %s2168_s27, 16  ;;  %s2678_s18 = scalar_lea.vmem %s2168_s27, 32 }
 0x606   :  { %p2675_p10 = scmp.ne.s32.totalorder %s2168_s27, %s2674_s7  ;;  %p2679_p11 = scmp.lt.s32.totalorder %s2168_s27, %s2168_s27 }
 0x607   :  { %p2680_p12 = scmp.lt.s32.totalorder %s2678_s18, %s2674_s7 }
 0x609   :  { %p2681_p13 = por %p2680_p12, %p2679_p11 }
 0x60b   :  { %p2682_p0 = pnand %p2681_p13, %p2675_p10 }
 0x60d   :  { %2685 = shalt.err (!%p2682_p0)
}
 0x60e   :  { %2170 = dma.vmem_to_hbm [thread:$0]  %s2168_s27, 16, %s4023_s17, [#allocation5]  }
 0x60f   :  { %2694 = dma.done.wait [#allocation3], 256  }
 0x610   :  { %2695 = vsyncadd [#allocation3], 4294967040 }
 0x611   :  { %2696 = dma.done.wait [#allocation5], 32  }
 0x612   :  { %2697 = vsyncadd [#allocation5], 4294967264 }
 0x613   :  { %2180 = vsyncpa [#allocation3], 1 }
 0x614   :  { %2181 = vsyncpa [#allocation5], 1 }

</bundles_post_ra>
